<compile_context>
chip_gen: v5e
topology: v5e:2x2
jax: 0.10.0
libtpu: 0.0.40
codegen_flags: <defaults>
</compile_context>

<pallas_src>
import math

import jax
import jax.numpy as jnp
from jax.experimental import pallas as pl
from jax.experimental.pallas import tpu as pltpu


def _round_up(x, m):
    return ((x + m - 1) // m) * m


def _cdiv(a, b):
    return (a + b - 1) // b


def _num_tensorcores_per_chip():
    """Heuristic: v7x exposes 2 TensorCores per chip; v5e/v6e have 1."""
    try:
        kind = jax.devices()[0].device_kind.lower()
    except Exception:
        return 1
    return 2 if ("v7" in kind or "7x" in kind) else 1


def _choose_tiling(M, tile_m, two_tc):
    """Row-tile size, grid steps and padded M.

    Single TC : biggest tile that covers M (fewest steps, longest DMA bursts).
    Two TCs   : even number of grid steps so both cores get balanced work.
    """
    tile_m = max(8, _round_up(tile_m, 8))
    if not two_tc:
        tm = min(tile_m, _round_up(M, 8))
        steps = _cdiv(M, tm)
    else:
        tm = min(tile_m, _round_up(_cdiv(M, 2), 8))
        steps = _cdiv(M, tm)
        if steps % 2:
            # shrink the tile so the step count is even with minimal padding
            steps += 1
            tm = _round_up(_cdiv(M, steps), 8)
            steps = _cdiv(M, tm)
            if steps % 2:
                steps += 1
    return tm, steps, steps * tm


def _primarycaps_kernel(x_ref, wp_ref, bp_ref, wa_ref, ba_ref, pose_ref, act_ref):
    """x_ref: (tm, Kdim) bf16
    wp_ref: (Kdim, BPP) bf16, bp_ref: (1, BPP) f32
    wa_ref: (Kdim, Bact) bf16, ba_ref: (1, Bact) f32
    pose_ref: (tm, BPP), act_ref: (tm, Bact)

    pose = x @ Wp + bp            (linear, matches pose conv)
    act  = sigmoid(x @ Wa + ba)   (matches sigmoid(a conv))
    """
    x = x_ref[...]
    pose = jnp.dot(x, wp_ref[...], preferred_element_type=jnp.float32) + bp_ref[...]
    act = jnp.dot(x, wa_ref[...], preferred_element_type=jnp.float32) + ba_ref[...]
    pose_ref[...] = pose.astype(pose_ref.dtype)
    act_ref[...] = jax.nn.sigmoid(act).astype(act_ref.dtype)


def _extract_patches(x_nchw, K, stride, padding, compute_dtype):
    """Return (x_flat (M, Kdim) in compute_dtype, Hout, Wout, Kdim).

    Patch feature order matches PyTorch conv weight layout [c, kh, kw].
    """
    N, A, H, W = x_nchw.shape
    # cast BEFORE any transpose/pad: halves the write half of those passes
    x = x_nchw.astype(compute_dtype)

    if K == 1 and padding == 0:
        x_nhwc = jnp.transpose(x, (0, 2, 3, 1))
        if stride != 1:
            x_nhwc = x_nhwc[:, ::stride, ::stride, :]
        Hout, Wout = x_nhwc.shape[1], x_nhwc.shape[2]
        return x_nhwc.reshape(N * Hout * Wout, A), Hout, Wout, A

    # TODO(synk): for K>1 fuse patch extraction into the matmul grid (short
    # "arbitrary" reduction axis over kh,kw with overlapping-window index_maps)
    # instead of materializing im2col in HBM.  At minimum it is bf16 here.
    if padding > 0:
        x = jnp.pad(x, ((0, 0), (0, 0), (padding, padding), (padding, padding)))
        H += 2 * padding
        W += 2 * padding
    Hout = (H - K) // stride + 1
    Wout = (W - K) // stride + 1
    x_nhwc = jnp.transpose(x, (0, 2, 3, 1))  # (N, H, W, A)
    slabs = []
    for dy in range(K):
        for dx in range(K):
            slabs.append(
                x_nhwc[:, dy:dy + stride * Hout:stride, dx:dx + stride * Wout:stride, :])
    patches = jnp.stack(slabs, axis=3)                 # (N, Ho, Wo, K*K, A)
    patches = jnp.transpose(patches, (0, 1, 2, 4, 3))  # (..., A, K*K) -> [c, kh, kw]
    Kdim = A * K * K
    return patches.reshape(N * Hout * Wout, Kdim), Hout, Wout, Kdim


def primary_caps_forward(x_nchw, w_pose, b_pose, w_a, b_a, *, K, P, stride, padding,
                         tile_m=2048, compute_dtype=jnp.bfloat16,
                         out_dtype=jnp.float32):
    """Pallas implementation of PrimaryCaps.forward.

    x_nchw : (N, A, H, W) float32
    w_pose : (B*P*P, A, K, K), b_pose : (B*P*P,)
    w_a    : (B,     A, K, K), b_a    : (B,)
    Returns (out, pose_out, a_out), each NHWC -- matching the PyTorch permutes.
    """
    N, A, H, W = x_nchw.shape
    BPP = w_pose.shape[0]
    Bact = w_a.shape[0]
    Cout = BPP + Bact

    # ---- input patches -> (M, Kdim) in bf16 -------------------------------
    x_flat, Hout, Wout, Kdim = _extract_patches(x_nchw, K, stride, padding, compute_dtype)
    M = N * Hout * Wout

    # ---- weights / biases, PyTorch [c, kh, kw] feature order --------------
    wp = jnp.transpose(w_pose.reshape(BPP, Kdim)).astype(compute_dtype)   # (Kdim, BPP)
    wa = jnp.transpose(w_a.reshape(Bact, Kdim)).astype(compute_dtype)     # (Kdim, Bact)
    bp = b_pose.reshape(1, BPP).astype(jnp.float32)
    ba = b_a.reshape(1, Bact).astype(jnp.float32)

    # ---- generation-aware row tiling ---------------------------------------
    two_tc = _num_tensorcores_per_chip() >= 2
    tm, steps, M_pad = _choose_tiling(M, tile_m, two_tc)
    if M_pad != M:
        x_flat = jnp.pad(x_flat, ((0, M_pad - M), (0, 0)))

    # ---- VMEM budget (double-buffered blocks) -> explicit scoped limit -----
    cd_item = jnp.dtype(compute_dtype).itemsize
    out_item = jnp.dtype(out_dtype).itemsize
    vmem_est = (2 * tm * Kdim * cd_item            # input tiles
                + 2 * Kdim * Cout * cd_item        # weights
                + 2 * Cout * 4                     # biases
                + 2 * tm * Cout * out_item)        # split outputs
    vmem_limit = int(min(max(2 * vmem_est, 16 << 20), 48 << 20))

    cost = pl.CostEstimate(
        flops=2 * M_pad * Kdim * Cout,
        bytes_accessed=(M_pad * Kdim * cd_item
                        + Kdim * Cout * cd_item + Cout * 4
                        + M_pad * Cout * out_item),
        transcendentals=M_pad * Bact,
    )

    pose_flat, act_flat = pl.pallas_call(
        _primarycaps_kernel,
        out_shape=(jax.ShapeDtypeStruct((M_pad, BPP), out_dtype),
                   jax.ShapeDtypeStruct((M_pad, Bact), out_dtype)),
        grid_spec=pltpu.PrefetchScalarGridSpec(
            num_scalar_prefetch=0,
            grid=(steps,),
            in_specs=[
                pl.BlockSpec((tm, Kdim), lambda i: (i, 0)),
                pl.BlockSpec((Kdim, BPP), lambda i: (0, 0)),
                pl.BlockSpec((1, BPP), lambda i: (0, 0)),
                pl.BlockSpec((Kdim, Bact), lambda i: (0, 0)),
                pl.BlockSpec((1, Bact), lambda i: (0, 0)),
            ],
            out_specs=(
                pl.BlockSpec((tm, BPP), lambda i: (i, 0)),
                pl.BlockSpec((tm, Bact), lambda i: (i, 0)),
            ),
        ),
        compiler_params=pltpu.CompilerParams(
            dimension_semantics=("parallel",),
            vmem_limit_bytes=vmem_limit,
        ),
        cost_estimate=cost,
    )(x_flat, wp, bp, wa, ba)

    # strip row padding only if it exists (avoids a needless output-sized copy)
    if M_pad != M:
        pose_flat = pose_flat[:M]
        act_flat = act_flat[:M]
    pose_out = pose_flat.reshape(N, Hout, Wout, BPP)
    a_out = act_flat.reshape(N, Hout, Wout, Bact)
    out = jnp.concatenate([pose_out, a_out], axis=-1)   # fused slab per module contract
    return out, pose_out, a_out


def _init_conv_params(key, out_ch, in_ch, K):
    """Deterministic PyTorch-style (uniform, fan-in bound) conv init."""
    kw, kb = jax.random.split(key)
    fan_in = in_ch * K * K
    bound = 1.0 / math.sqrt(fan_in)
    w = jax.random.uniform(kw, (out_ch, in_ch, K, K), jnp.float32, -bound, bound)
    b = jax.random.uniform(kb, (out_ch,), jnp.float32, -bound, bound)
    return w, b


if __name__ == "__main__":
    # Small shapes consistent with the module: A input channels, B capsule
    # types, P*P pose matrix, K=1 conv (the configuration CapsNet uses for
    # PrimaryCaps), stride=1, padding=0.  B*P*P = 128 -> lane-dense pose store.
    Nb, A, H, W = 2, 16, 16, 16
    B, P, K, stride, padding = 8, 4, 1, 1, 0

    key = jax.random.PRNGKey(0)
    kx, kp, ka = jax.random.split(key, 3)

    x = jax.random.normal(kx, (Nb, A, H, W), dtype=jnp.float32)   # NCHW like PyTorch
    w_pose, b_pose = _init_conv_params(kp, B * P * P, A, K)
    w_a, b_a = _init_conv_params(ka, B, A, K)

    out, pose_out, a_out = primary_caps_forward(
        x, w_pose, b_pose, w_a, b_a, K=K, P=P, stride=stride, padding=padding
    )
    jax.block_until_ready((out, pose_out, a_out))

    # shapes match the PyTorch contract (NHWC after permute)
    assert out.shape == (Nb, H, W, B * P * P + B)
    assert pose_out.shape == (Nb, H, W, B * P * P)
    assert a_out.shape == (Nb, H, W, B)

    # reference check (1x1 conv == per-pixel matmul); use the same bf16-rounded
    # operands as the kernel, accumulated in f32
    x_bf = jnp.transpose(x, (0, 2, 3, 1)).astype(jnp.bfloat16).astype(jnp.float32)
    wp_bf = w_pose.reshape(B * P * P, A).astype(jnp.bfloat16).astype(jnp.float32)
    wa_bf = w_a.reshape(B, A).astype(jnp.bfloat16).astype(jnp.float32)
    pose_ref = jnp.einsum("nhwc,oc->nhwo", x_bf, wp_bf,
                          precision=jax.lax.Precision.HIGHEST) + b_pose
    a_ref = jax.nn.sigmoid(
        jnp.einsum("nhwc,oc->nhwo", x_bf, wa_bf,
                   precision=jax.lax.Precision.HIGHEST) + b_a)
    ref = jnp.concatenate([pose_ref, a_ref], axis=-1)
    assert jnp.allclose(out, ref, atol=1e-2, rtol=1e-2)
    assert jnp.allclose(pose_out, pose_ref, atol=1e-2, rtol=1e-2)
    assert jnp.allclose(a_out, a_ref, atol=1e-2, rtol=1e-2)

    print("KERNEL_OK")
</pallas_src>

<mosaic_0001>
module attributes {stable_mosaic.version = 11 : i64} {
  func.func @_primarycaps_kernel(%arg0: i32, %arg1: memref<512x16xbf16, #tpu.memory_space<vmem>>, %arg2: memref<16x128xbf16, #tpu.memory_space<vmem>>, %arg3: memref<1x128xf32, #tpu.memory_space<vmem>>, %arg4: memref<16x8xbf16, #tpu.memory_space<vmem>>, %arg5: memref<1x8xf32, #tpu.memory_space<vmem>>, %arg6: memref<512x128xf32, #tpu.memory_space<vmem>>, %arg7: memref<512x8xf32, #tpu.memory_space<vmem>>) attributes {dimension_semantics = [#tpu.dimension_semantics<parallel>], iteration_bounds = array<i64: 1>, scalar_prefetch = 0 : i64, scratch_operands = 0 : i64, tpu.core_type = #tpu.core_type<tc>, window_params = [{transform_indices = @transform_0, window_bounds = array<i64: 512, 16>}, {pipeline_mode = #tpu.pipeline_mode<synchronous>, transform_indices = @transform_1, window_bounds = array<i64: 16, 128>}, {pipeline_mode = #tpu.pipeline_mode<synchronous>, transform_indices = @transform_2, window_bounds = array<i64: 1, 128>}, {pipeline_mode = #tpu.pipeline_mode<synchronous>, transform_indices = @transform_3, window_bounds = array<i64: 16, 8>}, {pipeline_mode = #tpu.pipeline_mode<synchronous>, transform_indices = @transform_4, window_bounds = array<i64: 1, 8>}, {transform_indices = @transform_5, window_bounds = array<i64: 512, 128>}, {transform_indices = @transform_6, window_bounds = array<i64: 512, 8>}]} {
    %c0 = arith.constant 0 : index
    %c0_0 = arith.constant 0 : index
    %0 = vector.load %arg1[%c0, %c0_0] : memref<512x16xbf16, #tpu.memory_space<vmem>>, vector<512x16xbf16>
    %c0_1 = arith.constant 0 : index
    %c0_2 = arith.constant 0 : index
    %1 = vector.load %arg2[%c0_1, %c0_2] : memref<16x128xbf16, #tpu.memory_space<vmem>>, vector<16x128xbf16>
    %cst = arith.constant dense<0.000000e+00> : vector<512x128xf32>
    %2 = tpu.matmul %0, %1, %cst {dimension_numbers = #tpu.dot_dimension_numbers<[1], [0], [0], [1], [0, 0, 1, 1], [], []>} : vector<512x16xbf16>, vector<16x128xbf16>, vector<512x128xf32> -> vector<512x128xf32>
    %c0_3 = arith.constant 0 : index
    %c0_4 = arith.constant 0 : index
    %3 = vector.load %arg3[%c0_3, %c0_4] : memref<1x128xf32, #tpu.memory_space<vmem>>, vector<1x128xf32>
    %4 = vector.broadcast %3 : vector<1x128xf32> to vector<512x128xf32>
    %5 = arith.addf %2, %4 : vector<512x128xf32>
    %c0_5 = arith.constant 0 : index
    %c0_6 = arith.constant 0 : index
    %6 = vector.load %arg4[%c0_5, %c0_6] : memref<16x8xbf16, #tpu.memory_space<vmem>>, vector<16x8xbf16>
    %cst_7 = arith.constant dense<0.000000e+00> : vector<512x8xf32>
    %7 = tpu.matmul %0, %6, %cst_7 {dimension_numbers = #tpu.dot_dimension_numbers<[1], [0], [0], [1], [0, 0, 1, 1], [], []>} : vector<512x16xbf16>, vector<16x8xbf16>, vector<512x8xf32> -> vector<512x8xf32>
    %c0_8 = arith.constant 0 : index
    %c0_9 = arith.constant 0 : index
    %8 = vector.load %arg5[%c0_8, %c0_9] : memref<1x8xf32, #tpu.memory_space<vmem>>, vector<1x8xf32>
    %9 = vector.broadcast %8 : vector<1x8xf32> to vector<512x8xf32>
    %10 = arith.addf %7, %9 : vector<512x8xf32>
    %c0_10 = arith.constant 0 : index
    %c0_11 = arith.constant 0 : index
    %11 = vector.load %arg6[%c0_10, %c0_11] : memref<512x128xf32, #tpu.memory_space<vmem>>, vector<512x128xf32>
    tpu.vector_store %arg6[%c0_10, %c0_11], %5 {strides = array<i32>} : memref<512x128xf32, #tpu.memory_space<vmem>>, vector<512x128xf32>,
    %12 = arith.negf %10 : vector<512x8xf32>
    %13 = math.exp %12 : vector<512x8xf32>
    %cst_12 = arith.constant 1.000000e+00 : f32
    %14 = vector.broadcast %cst_12 : f32 to vector<512x8xf32>
    %15 = arith.addf %14, %13 : vector<512x8xf32>
    %16 = arith.divf %14, %15 : vector<512x8xf32>
    %c0_13 = arith.constant 0 : index
    %c0_14 = arith.constant 0 : index
    %17 = vector.load %arg7[%c0_13, %c0_14] : memref<512x8xf32, #tpu.memory_space<vmem>>, vector<512x8xf32>
    tpu.vector_store %arg7[%c0_13, %c0_14], %16 {strides = array<i32>} : memref<512x8xf32, #tpu.memory_space<vmem>>, vector<512x8xf32>,
    return
  }
  func.func @transform_0(%arg0: i32) -> (i32, i32) {
    %c0_i32 = arith.constant 0 : i32
    %c0_i32_0 = arith.constant 0 : i32
    return %arg0, %c0_i32 : i32, i32
  }
  func.func @transform_1(%arg0: i32) -> (i32, i32) {
    %c0_i32 = arith.constant 0 : i32
    %c0_i32_0 = arith.constant 0 : i32
    %c0_i32_1 = arith.constant 0 : i32
    return %c0_i32, %c0_i32_0 : i32, i32
  }
  func.func @transform_2(%arg0: i32) -> (i32, i32) {
    %c0_i32 = arith.constant 0 : i32
    %c0_i32_0 = arith.constant 0 : i32
    %c0_i32_1 = arith.constant 0 : i32
    return %c0_i32, %c0_i32_0 : i32, i32
  }
  func.func @transform_3(%arg0: i32) -> (i32, i32) {
    %c0_i32 = arith.constant 0 : i32
    %c0_i32_0 = arith.constant 0 : i32
    %c0_i32_1 = arith.constant 0 : i32
    return %c0_i32, %c0_i32_0 : i32, i32
  }
  func.func @transform_4(%arg0: i32) -> (i32, i32) {
    %c0_i32 = arith.constant 0 : i32
    %c0_i32_0 = arith.constant 0 : i32
    %c0_i32_1 = arith.constant 0 : i32
    return %c0_i32, %c0_i32_0 : i32, i32
  }
  func.func @transform_5(%arg0: i32) -> (i32, i32) {
    %c0_i32 = arith.constant 0 : i32
    %c0_i32_0 = arith.constant 0 : i32
    return %arg0, %c0_i32 : i32, i32
  }
  func.func @transform_6(%arg0: i32) -> (i32, i32) {
    %c0_i32 = arith.constant 0 : i32
    %c0_i32_0 = arith.constant 0 : i32
    return %arg0, %c0_i32 : i32, i32
  }
}

</mosaic_0001>

<bundles_post_ra>
// kernel: tpu_custom_call.1
= control target key start
LH: loop header
LB: loop body
LE: loop exit
PB: predicated region body
PF: predicated region fallthrough
CT: control target
= control target key end

     0   :  { %vm260_vm0 = vcmask 130048   ;;  %s4530_s0 = inlined_call_operand.vmem [shape: bf16[512,16], index: 0, kind: input, shape index: {}]   ;;  %s4531_s1 = inlined_call_operand.vmem [shape: bf16[16,128], index: 1, kind: input, shape index: {}]   ;;  %s4532_s2 = inlined_call_operand.vmem [shape: f32[1,128], index: 2, kind: input, shape index: {}]   ;;  %s4533_s3 = inlined_call_operand.vmem [shape: bf16[16,8], index: 3, kind: input, shape index: {}]   ;;  %s4534_s4 = inlined_call_operand.vmem [shape: f32[1,8], index: 4, kind: input, shape index: {}]   ;;  %s4535_s5 = inlined_call_operand.hbm [shape: f32[512,128], index: 5, kind: output, shape index: {0}]   ;;  %s4536_s6 = inlined_call_operand.vmem [shape: f32[512,8], index: 6, kind: output, shape index: {1}]  }
   0x1   :  { %v2371_v0 = vld [vmem:[%s4533_s3] sm:$0xff] }
   0x2   :  { %v2338_v1 = vld [vmem:[%s4530_s0] sm:$0xff]  ;;  %545 = vmatpush.bf16.msra.mxu1 %v2371_v0  ;;  %2373 = vmatpush.bf16.msra.mxu3 %v2371_v0 }
   0x3   :  { %v2354_v2 = vld [vmem:[%s4530_s0 + $0x80] sm:$0xff] }
   0x4   :  { %v2370_v3 = vld [vmem:[%s4531_s1] sm:$0xff] }
   0x5   :  { %2372 = vmatpush.bf16.msra.mxu2 %v2370_v3  ;;  %364 = vmatpush.bf16.msra.mxu0 %v2370_v3 }
   0x6   :  { %12 = vsyncpa [#allocation3], 0  ;;  %2242 = vmatmul.msk.bf16.vlgmr.msra.gmra.mxu1 %vm260_vm0, %v2338_v1  ;;  %2258 = vmatmul.msk.bf16.vlgmr.msra.gmra.mxu3 %vm260_vm0, %v2354_v2  ;;  %v2339_v4 = vld [vmem:[%s4530_s0 + $0x8] sm:$0xff]  ;;  %v2340_v6 = vld [vmem:[%s4530_s0 + $0x10] sm:$0xff]  ;;  %vm1987_vm1 = vcmask 64512   ;;  %s2058_s12 = sshll.u32 %s4535_s5, 4  ;;  %s2059_s12 = int_to_ptr.hbm [resolvable:$true] %s2058_s12 }
   0x7   :  { %v2355_v5 = vld [vmem:[%s4530_s0 + $0x88] sm:$0xff]  ;;  %v2356_v7 = vld [vmem:[%s4530_s0 + $0x90] sm:$0xff]  ;;  %v2341_v8 = vld [vmem:[%s4530_s0 + $0x18] sm:$0xff]  ;;  %s2667_s16 = smov 128   ;;  %s2668_s17 = smov 8  }
   0x8   :  { %2222 = vmatmul.msk.bf16.vlgmr.msra.gmra.mxu2 %vm260_vm0, %v2354_v2  ;;  %2206 = vmatmul.msk.bf16.vlgmr.msra.gmra.mxu0 %vm260_vm0, %v2338_v1  ;;  %v2357_v9 = vld [vmem:[%s4530_s0 + $0x98] sm:$0xff]  ;;  %v2342_v10 = vld [vmem:[%s4530_s0 + $0x20] sm:$0xff]  ;;  %v2343_v12 = vld [vmem:[%s4530_s0 + $0x28] sm:$0xff] }
   0x9   :  { %v2358_v11 = vld [vmem:[%s4530_s0 + $0xa0] sm:$0xff]  ;;  %v2359_v13 = vld [vmem:[%s4530_s0 + $0xa8] sm:$0xff]  ;;  %v2344_v14 = vld [vmem:[%s4530_s0 + $0x30] sm:$0xff] }
   0xa   :  { %v2360_v15 = vld [vmem:[%s4530_s0 + $0xb0] sm:$0xff]  ;;  %v2345_v16 = vld [vmem:[%s4530_s0 + $0x38] sm:$0xff]  ;;  %v2793_v18 = vld [vmem:[%s4534_s4] ss:$0 sm:$0xff] }
   0xb   :  { %v2361_v17 = vld [vmem:[%s4530_s0 + $0xb8] sm:$0xff]  ;;  %v2346_v19 = vld [vmem:[%s4530_s0 + $0x40] sm:$0xff]  ;;  %v2347_v41 = vld [vmem:[%s4530_s0 + $0x48] sm:$0xff] }
   0xc   :  { %v2362_v20 = vld [vmem:[%s4530_s0 + $0xc0] sm:$0xff]  ;;  %v2363_v42 = vld [vmem:[%s4530_s0 + $0xc8] sm:$0xff] }
   0xd   :  { %v2809_v25 = vld [vmem:[%s4532_s2] ss:$0 sm:$0xff] }
  0x16   :  { %2243 = vmatmul.msk.bf16.gmra.mxu1 %vm260_vm0, %v2339_v4  ;;  %2259 = vmatmul.msk.bf16.gmra.mxu3 %vm260_vm0, %v2355_v5 }
  0x18   :  { %2223 = vmatmul.msk.bf16.gmra.mxu2 %vm260_vm0, %v2355_v5  ;;  %2207 = vmatmul.msk.bf16.gmra.mxu0 %vm260_vm0, %v2339_v4 }
  0x26   :  { %2244 = vmatmul.msk.bf16.gmra.mxu1 %vm260_vm0, %v2340_v6  ;;  %2260 = vmatmul.msk.bf16.gmra.mxu3 %vm260_vm0, %v2356_v7 }
  0x28   :  { %2224 = vmatmul.msk.bf16.gmra.mxu2 %vm260_vm0, %v2356_v7  ;;  %2208 = vmatmul.msk.bf16.gmra.mxu0 %vm260_vm0, %v2340_v6 }
  0x36   :  { %2245 = vmatmul.msk.bf16.gmra.mxu1 %vm260_vm0, %v2341_v8  ;;  %2261 = vmatmul.msk.bf16.gmra.mxu3 %vm260_vm0, %v2357_v9 }
  0x38   :  { %2225 = vmatmul.msk.bf16.gmra.mxu2 %vm260_vm0, %v2357_v9  ;;  %2209 = vmatmul.msk.bf16.gmra.mxu0 %vm260_vm0, %v2341_v8 }
  0x46   :  { %2246 = vmatmul.msk.bf16.gmra.mxu1 %vm260_vm0, %v2342_v10  ;;  %2262 = vmatmul.msk.bf16.gmra.mxu3 %vm260_vm0, %v2358_v11 }
  0x48   :  { %2226 = vmatmul.msk.bf16.gmra.mxu2 %vm260_vm0, %v2358_v11  ;;  %2210 = vmatmul.msk.bf16.gmra.mxu0 %vm260_vm0, %v2342_v10 }
  0x56   :  { %2247 = vmatmul.msk.bf16.gmra.mxu1 %vm260_vm0, %v2343_v12  ;;  %2263 = vmatmul.msk.bf16.gmra.mxu3 %vm260_vm0, %v2359_v13 }
  0x58   :  { %2227 = vmatmul.msk.bf16.gmra.mxu2 %vm260_vm0, %v2359_v13  ;;  %2211 = vmatmul.msk.bf16.gmra.mxu0 %vm260_vm0, %v2343_v12 }
  0x66   :  { %2248 = vmatmul.msk.bf16.gmra.mxu1 %vm260_vm0, %v2344_v14  ;;  %2264 = vmatmul.msk.bf16.gmra.mxu3 %vm260_vm0, %v2360_v15 }
  0x68   :  { %2228 = vmatmul.msk.bf16.gmra.mxu2 %vm260_vm0, %v2360_v15  ;;  %2212 = vmatmul.msk.bf16.gmra.mxu0 %vm260_vm0, %v2344_v14 }
  0x76   :  { %2249 = vmatmul.msk.bf16.gmra.mxu1 %vm260_vm0, %v2345_v16  ;;  %2265 = vmatmul.msk.bf16.gmra.mxu3 %vm260_vm0, %v2361_v17 }
  0x78   :  { %2229 = vmatmul.msk.bf16.gmra.mxu2 %vm260_vm0, %v2361_v17  ;;  %2213 = vmatmul.msk.bf16.gmra.mxu0 %vm260_vm0, %v2345_v16 }
  0x83   :  { %v547_v21 = vpop.f32.mrf.mxu1 }
  0x84   :  { %v548_v22 = vadd.f32 %v2793_v18, %v547_v21 }
  0x85   :  { %v366_v23 = vpop.f32.mrf.mxu0 }
  0x86   :  { %v2274_v24 = vmul.f32 -1.442695, %v548_v22  ;;  %2250 = vmatmul.msk.bf16.gmra.mxu1 %vm260_vm0, %v2346_v19  ;;  %2266 = vmatmul.msk.bf16.gmra.mxu3 %vm260_vm0, %v2362_v20  ;;  %v367_v28 = vadd.f32 %v2809_v25, %v366_v23 }
  0x88   :  { %2230 = vmatmul.msk.bf16.gmra.mxu2 %vm260_vm0, %v2362_v20  ;;  %2214 = vmatmul.msk.bf16.gmra.mxu0 %vm260_vm0, %v2346_v19  ;;  %2379 = vpow2.f32 %v2274_v24  ;;  %707 = vst [vmem:[#allocation2] sm:$0xff] %v367_v28  ;;  %v2364_v28 = vld [vmem:[%s4530_s0 + $0xd0] sm:$0xff] }
  0x89   :  { %v627_v26 = vpop.f32.mrf.mxu3 }
  0x8a   :  { %v628_v27 = vadd.f32 %v2793_v18, %v627_v26 }
  0x8b   :  { %v446_v29 = vpop.f32.mrf.mxu2  ;;  %v549_v30 = vpop.f32.mrf.mxu1 }
  0x8c   :  { %v447_v31 = vadd.f32 %v2809_v25, %v446_v29  ;;  %v2306_v32 = vmul.f32 -1.442695, %v628_v27  ;;  %v550_v33 = vadd.f32 %v2793_v18, %v549_v30  ;;  %v2348_v27 = vld [vmem:[%s4530_s0 + $0x50] sm:$0xff] }
  0x8d   :  { %v368_v34 = vpop.f32.mrf.mxu0 }
  0x8e   :  { %739 = vst [vmem:[#allocation2 + $0x100] sm:$0xff] %v447_v31  ;;  %v369_v35 = vadd.f32 %v2809_v25, %v368_v34  ;;  %v2380_v36 = vpop.eup %2379  ;;  %2381 = vpow2.f32 %v2306_v32  ;;  %v2275_v37 = vmul.f32 -1.442695, %v550_v33 }
  0x8f   :  { %v963_v38 = vadd.f32 1.0, %v2380_v36 }
  0x90   :  { %708 = vst [vmem:[#allocation2 + $0x8] sm:$0xff] %v369_v35  ;;  %2383 = vpow2.f32 %v2275_v37 }
  0x91   :  { %2385 = vrcp.f32 %v963_v38  ;;  %v629_v39 = vpop.f32.mrf.mxu3  ;;  %v1036_v58 = vand.u32 2147483647, %v963_v38  ;;  %v1038_v60 = vand.u32 2147483648, %v963_v38  ;;  %vm1032_vm2 = vweird.f32 %v963_v38 }
  0x92   :  { %v630_v40 = vadd.f32 %v2793_v18, %v629_v39 }
  0x93   :  { %v448_v43 = vpop.f32.mrf.mxu2  ;;  %v552_v44 = vpop.f32.mrf.mxu1  ;;  %vm1037_vm4 = vcmp.eq.f32.partialorder %v1036_v58, 8.507059e+37  ;;  %v1039_v12 = vor.u32 1.1754944e-38, %v1038_v60 }
  0x94   :  { %v449_v45 = vadd.f32 %v2809_v25, %v448_v43  ;;  %v2382_v46 = vpop.eup %2381  ;;  %v2307_v47 = vmul.f32 -1.442695, %v630_v40  ;;  %v553_v48 = vadd.f32 %v2793_v18, %v552_v44 }
  0x95   :  { %v371_v49 = vpop.f32.mrf.mxu0  ;;  %v2825_v50 = vadd.f32 1.0, %v2382_v46 }
  0x96   :  { %740 = vst [vmem:[#allocation2 + $0x108] sm:$0xff] %v449_v45  ;;  %v2384_v51 = vpop.eup %2383  ;;  %2387 = vpow2.f32 %v2307_v47  ;;  %v2276_v52 = vmul.f32 -1.442695, %v553_v48  ;;  %2251 = vmatmul.msk.bf16.gmra.mxu1 %vm260_vm0, %v2347_v41  ;;  %2267 = vmatmul.msk.bf16.gmra.mxu3 %vm260_vm0, %v2363_v42  ;;  %v372_v7 = vadd.f32 %v2809_v25, %v371_v49 }
  0x97   :  { %v2386_v53 = vpop.eup %2385  ;;  %2389 = vrcp.f32 %v2825_v50  ;;  %v2832_v55 = vadd.f32 1.0, %v2384_v51  ;;  %v1516_v4 = vand.u32 2147483647, %v2825_v50  ;;  %v1518_v11 = vand.u32 2147483648, %v2825_v50 }
  0x98   :  { %2231 = vmatmul.msk.bf16.gmra.mxu2 %vm260_vm0, %v2363_v42  ;;  %2215 = vmatmul.msk.bf16.gmra.mxu0 %vm260_vm0, %v2347_v41  ;;  %v1028_v54 = vmul.f32 %v2386_v53, %v963_v38  ;;  %2391 = vpow2.f32 %v2276_v52  ;;  %vm1033_vm3 = vweird.f32 %v2386_v53  ;;  %vm1512_vm6 = vweird.f32 %v2825_v50  ;;  %709 = vst [vmem:[#allocation2 + $0x10] sm:$0xff] %v372_v7 }
  0x99   :  { %v632_v56 = vpop.f32.mrf.mxu3  ;;  %2393 = vrcp.f32 %v2832_v55  ;;  %vm1034_vm5 = vmor %vm1032_vm2, %vm1033_vm3  ;;  %vm2849_vm7 = vcmp.eq.f32.partialorder %v1516_v4, 8.507059e+37  ;;  %v1051_v22 = vand.u32 2147483647, %v2832_v55  ;;  %v1519_v26 = vor.u32 1.1754944e-38, %v1518_v11 }
  0x9a   :  { %v1029_v57 = vsub.f32 1.0, %v1028_v54  ;;  %v633_v61 = vadd.f32 %v2793_v18, %v632_v56  ;;  %vm1047_vm9 = vweird.f32 %v2832_v55  ;;  %v1053_v31 = vand.u32 2147483648, %v2832_v55 }
  0x9b   :  { %v451_v59 = vpop.f32.mrf.mxu2  ;;  %v554_v62 = vpop.f32.mrf.mxu1  ;;  %vm2879_vm12 = vcmp.eq.f32.partialorder %v1051_v22, 8.507059e+37 }
  0x9c   :  { %v2388_v63 = vpop.eup %2387  ;;  %v1030_v0 = vmul.f32 %v2386_v53, %v1029_v57  ;;  %v555_v1 = vadd.f32 %v2793_v18, %v554_v62  ;;  %v2308_v6 = vmul.f32 -1.442695, %v633_v61  ;;  %v452_v36 = vadd.f32 %v2809_v25, %v451_v59 }
  0x9d   :  { %v373_v2 = vpop.f32.mrf.mxu0  ;;  %v2390_v3 = vpop.eup %2389  ;;  %v2838_v5 = vadd.f32 1.0, %v2388_v63  ;;  %v1054_v52 = vor.u32 1.1754944e-38, %v1053_v31  ;;  %v2349_v31 = vld [vmem:[%s4530_s0 + $0x58] sm:$0xff] }
  0x9e   :  { %v2392_v8 = vpop.eup %2391  ;;  %v1031_v9 = vadd.f32 %v2386_v53, %v1030_v0  ;;  %v1508_v10 = vmul.f32 %v2390_v3, %v2825_v50  ;;  %v2277_v13 = vmul.f32 -1.442695, %v555_v1  ;;  %vm1513_vm8 = vweird.f32 %v2390_v3  ;;  %741 = vst [vmem:[#allocation2 + $0x110] sm:$0xff] %v452_v36 }
  0x9f   :  { %2395 = vrcp.f32 %v2838_v5  ;;  %v2845_v14 = vpop.eup %2393  ;;  %v2847_v17 = vadd.f32 1.0, %v2392_v8  ;;  %vm1514_vm10 = vmor %vm1512_vm6, %vm1513_vm8  ;;  %v374_v40 = vadd.f32 %v2809_v25, %v373_v2  ;;  %v1533_v44 = vand.u32 2147483648, %v2838_v5 }
  0xa0   :  { %v1035_v15 = vsel %vm1034_vm5, %v2386_v53, %v1031_v9  ;;  %v1509_v16 = vsub.f32 1.0, %v1508_v10  ;;  %2397 = vpow2.f32 %v2308_v6  ;;  %v1043_v21 = vmul.f32 %v2845_v14, %v2832_v55 }
  0xa1   :  { %v1040_v19 = vsel %vm1037_vm4, %v1039_v12, %v1035_v15  ;;  %v634_v23 = vpop.f32.mrf.mxu3  ;;  %2399 = vrcp.f32 %v2847_v17  ;;  %vm1048_vm11 = vweird.f32 %v2845_v14  ;;  %710 = vst [vmem:[#allocation2 + $0x18] sm:$0xff] %v374_v40  ;;  %vm1527_vm14 = vweird.f32 %v2838_v5 }
  0xa2   :  { %1988 = vst.msk [vmem:[%s4536_s6] sm:$0xff] %vm1987_vm1, %v1040_v19  ;;  %v1510_v24 = vmul.f32 %v2390_v3, %v1509_v16  ;;  %v1044_v30 = vsub.f32 1.0, %v1043_v21  ;;  %2401 = vpow2.f32 %v2277_v13  ;;  %v635_v34 = vadd.f32 %v2793_v18, %v634_v23  ;;  %vm1049_vm13 = vmor %vm1047_vm9, %vm1048_vm11 }
  0xa3   :  { %v453_v29 = vpop.f32.mrf.mxu2  ;;  %v557_v32 = vpop.f32.mrf.mxu1  ;;  %v1531_v61 = vand.u32 2147483647, %v2838_v5  ;;  %v1534_v63 = vor.u32 1.1754944e-38, %v1533_v44  ;;  %v1066_v4 = vand.u32 2147483647, %v2847_v17  ;;  %v1068_v6 = vand.u32 2147483648, %v2847_v17 }
  0xa4   :  { %v1511_v33 = vadd.f32 %v2390_v3, %v1510_v24  ;;  %v558_v35 = vadd.f32 %v2793_v18, %v557_v32  ;;  %v1045_v38 = vmul.f32 %v2845_v14, %v1044_v30  ;;  %v2309_v45 = vmul.f32 -1.442695, %v635_v34  ;;  %v2365_v32 = vld [vmem:[%s4530_s0 + $0xd8] sm:$0xff] }
  0xa5   :  { %v2872_v37 = vpop.eup %2395  ;;  %v2889_v46 = vpop.f32.mrf.mxu0  ;;  %v454_v54 = vadd.f32 %v2809_v25, %v453_v29  ;;  %vm1062_vm3 = vweird.f32 %v2847_v17  ;;  %vm1532_vm5 = vcmp.eq.f32.partialorder %v1531_v61, 8.507059e+37 }
  0xa6   :  { %v2398_v41 = vpop.eup %2397  ;;  %v1515_v42 = vsel %vm1514_vm10, %v2390_v3, %v1511_v33  ;;  %v1523_v43 = vmul.f32 %v2872_v37, %v2838_v5  ;;  %2252 = vmatmul.msk.bf16.gmra.mxu1 %vm260_vm0, %v2348_v27  ;;  %2268 = vmatmul.msk.bf16.gmra.mxu3 %vm260_vm0, %v2364_v28  ;;  %v1046_v48 = vadd.f32 %v2845_v14, %v1045_v38  ;;  %v2278_v50 = vmul.f32 -1.442695, %v558_v35  ;;  %v2366_v35 = vld [vmem:[%s4530_s0 + $0xe0] sm:$0xff] }
  0xa7   :  { %v1520_v47 = vsel %vm2849_vm7, %v1519_v26, %v1515_v42  ;;  %v2894_v49 = vadd.f32 1.0, %v2398_v41  ;;  %v2400_v51 = vpop.eup %2399  ;;  %2403 = vpow2.f32 %v2309_v45  ;;  %vm1528_vm15 = vweird.f32 %v2872_v37  ;;  %742 = vst [vmem:[#allocation2 + $0x118] sm:$0xff] %v454_v54 }
  0xa8   :  { %2232 = vmatmul.msk.bf16.gmra.mxu2 %vm260_vm0, %v2364_v28  ;;  %2216 = vmatmul.msk.bf16.gmra.mxu0 %vm260_vm0, %v2348_v27  ;;  %2020 = vst.msk [vmem:[%s4536_s6 + $0x100] sm:$0xff] %vm1987_vm1, %v1520_v47  ;;  %v1524_v53 = vsub.f32 1.0, %v1523_v43  ;;  %v2402_v56 = vpop.eup %2401  ;;  %v1050_v57 = vsel %vm1049_vm13, %v2845_v14, %v1046_v48  ;;  %v1058_v58 = vmul.f32 %v2400_v51, %v2847_v17  ;;  %vm1529_vm2 = vmor %vm1527_vm14, %vm1528_vm15  ;;  %vm1063_vm4 = vweird.f32 %v2400_v51 }
  0xa9   :  { %2405 = vrcp.f32 %v2894_v49  ;;  %v637_v59 = vpop.f32.mrf.mxu3  ;;  %v1055_v60 = vsel %vm2879_vm12, %v1054_v52, %v1050_v57  ;;  %v2922_v1 = vadd.f32 1.0, %v2402_v56  ;;  %v1546_v11 = vand.u32 2147483647, %v2894_v49  ;;  %vm1064_vm6 = vmor %vm1062_vm3, %vm1063_vm4 }
  0xaa   :  { %v1525_v55 = vmul.f32 %v2872_v37, %v1524_v53  ;;  %1989 = vst.msk [vmem:[%s4536_s6 + $0x8] sm:$0xff] %vm1987_vm1, %v1055_v60  ;;  %v1059_v0 = vsub.f32 1.0, %v1058_v58  ;;  %2407 = vpow2.f32 %v2278_v50  ;;  %v638_v7 = vadd.f32 %v2793_v18, %v637_v59 }
  0xab   :  { %v2916_v62 = vpop.f32.mrf.mxu2  ;;  %v559_v2 = vpop.f32.mrf.mxu1  ;;  %2409 = vrcp.f32 %v2922_v1  ;;  %vm1067_vm7 = vcmp.eq.f32.partialorder %v1066_v4, 8.507059e+37  ;;  %v1069_v17 = vor.u32 1.1754944e-38, %v1068_v6  ;;  %v1548_v20 = vand.u32 2147483648, %v2894_v49 }
  0xac   :  { %v1526_v3 = vadd.f32 %v2872_v37, %v1525_v55  ;;  %v1060_v8 = vmul.f32 %v2400_v51, %v1059_v0  ;;  %v560_v12 = vadd.f32 %v2793_v18, %v559_v2  ;;  %v2310_v5 = vmul.f32 -1.442695, %v638_v7 }
  0xad   :  { %v2404_v9 = vpop.eup %2403  ;;  %v378_v21 = vpop.f32.mrf.mxu0  ;;  %vm1542_vm8 = vweird.f32 %v2894_v49  ;;  %v1081_v24 = vand.u32 2147483647, %v2922_v1  ;;  %vm2960_vm9 = vcmp.eq.f32.partialorder %v1546_v11, 8.507059e+37  ;;  %v377_v38 = vadd.f32 %v2809_v25, %v2889_v46 }
  0xae   :  { %v1530_v10 = vsel %vm1529_vm2, %v2872_v37, %v1526_v3  ;;  %v1061_v15 = vadd.f32 %v2400_v51, %v1060_v8  ;;  %v2935_v16 = vadd.f32 1.0, %v2404_v9  ;;  %v2279_v30 = vmul.f32 -1.442695, %v560_v12 }
  0xaf   :  { %v2406_v13 = vpop.eup %2405  ;;  %v1535_v14 = vsel %vm1532_vm5, %v1534_v63, %v1530_v10  ;;  %v1549_v40 = vor.u32 1.1754944e-38, %v1548_v20  ;;  %vm1077_vm11 = vweird.f32 %v2922_v1  ;;  %vm2970_vm12 = vcmp.eq.f32.partialorder %v1081_v24, 8.507059e+37  ;;  %711 = vst [vmem:[#allocation2 + $0x20] sm:$0xff] %v377_v38 }
  0xb0   :  { %2021 = vst.msk [vmem:[%s4536_s6 + $0x108] sm:$0xff] %vm1987_vm1, %v1535_v14  ;;  %v1538_v19 = vmul.f32 %v2406_v13, %v2894_v49  ;;  %v2408_v22 = vpop.eup %2407  ;;  %v1065_v23 = vsel %vm1064_vm6, %v2400_v51, %v1061_v15  ;;  %2411 = vrcp.f32 %v2935_v16  ;;  %vm1543_vm10 = vweird.f32 %v2406_v13 }
  0xb1   :  { %v639_v26 = vpop.f32.mrf.mxu3  ;;  %v1070_v27 = vsel %vm1067_vm7, %v1069_v17, %v1065_v23  ;;  %v2946_v29 = vadd.f32 1.0, %v2408_v22  ;;  %v2954_v34 = vpop.eup %2409  ;;  %2413 = vpow2.f32 %v2310_v5  ;;  %v1083_v43 = vand.u32 2147483648, %v2922_v1  ;;  %vm1544_vm13 = vmor %vm1542_vm8, %vm1543_vm10 }
  0xb2   :  { %v1539_v28 = vsub.f32 1.0, %v1538_v19  ;;  %1990 = vst.msk [vmem:[%s4536_s6 + $0x10] sm:$0xff] %vm1987_vm1, %v1070_v27  ;;  %v640_v36 = vadd.f32 %v2793_v18, %v639_v26  ;;  %v1073_v41 = vmul.f32 %v2954_v34, %v2922_v1  ;;  %v1561_v48 = vand.u32 2147483647, %v2935_v16 }
  0xb3   :  { %v458_v33 = vpop.f32.mrf.mxu2  ;;  %v562_v37 = vpop.f32.mrf.mxu1  ;;  %2415 = vrcp.f32 %v2946_v29  ;;  %v1563_v50 = vand.u32 2147483648, %v2935_v16  ;;  %v457_v52 = vadd.f32 %v2809_v25, %v2916_v62  ;;  %vm1078_vm14 = vweird.f32 %v2954_v34 }
  0xb4   :  { %v1540_v39 = vmul.f32 %v2406_v13, %v1539_v28  ;;  %v1074_v45 = vsub.f32 1.0, %v1073_v41  ;;  %2417 = vpow2.f32 %v2279_v30  ;;  %v2311_v46 = vmul.f32 -1.442695, %v640_v36  ;;  %vm1079_vm15 = vmor %vm1077_vm11, %vm1078_vm14 }
  0xb5   :  { %v563_v51 = vadd.f32 %v2793_v18, %v562_v37  ;;  %743 = vst [vmem:[#allocation2 + $0x120] sm:$0xff] %v457_v52  ;;  %v379_v60 = vadd.f32 %v2809_v25, %v378_v21  ;;  %v1084_v61 = vor.u32 1.1754944e-38, %v1083_v43  ;;  %v3001_v0 = vpop.f32.mrf.mxu0  ;;  %vm1557_vm2 = vweird.f32 %v2935_v16 }
  0xb6   :  { %v1541_v44 = vadd.f32 %v2406_v13, %v1540_v39  ;;  %2253 = vmatmul.msk.bf16.gmra.mxu1 %vm260_vm0, %v2349_v31  ;;  %2269 = vmatmul.msk.bf16.gmra.mxu3 %vm260_vm0, %v2365_v32  ;;  %v2412_v47 = vpop.eup %2411  ;;  %v1075_v54 = vmul.f32 %v2954_v34, %v1074_v45  ;;  %2419 = vpow2.f32 %v2311_v46  ;;  %v459_v6 = vadd.f32 %v2809_v25, %v458_v33 }
  0xb7   :  { %v1553_v49 = vmul.f32 %v2412_v47, %v2935_v16  ;;  %v2414_v56 = vpop.eup %2413  ;;  %v2280_v58 = vmul.f32 -1.442695, %v563_v51  ;;  %712 = vst [vmem:[#allocation2 + $0x28] sm:$0xff] %v379_v60  ;;  %vm1558_vm3 = vweird.f32 %v2412_v47  ;;  %vm3016_vm4 = vcmp.eq.f32.partialorder %v1561_v48, 8.507059e+37 }
  0xb8   :  { %2233 = vmatmul.msk.bf16.gmra.mxu2 %vm260_vm0, %v2365_v32  ;;  %2217 = vmatmul.msk.bf16.gmra.mxu0 %vm260_vm0, %v2349_v31  ;;  %v1545_v53 = vsel %vm1544_vm13, %v2406_v13, %v1541_v44  ;;  %v1076_v55 = vadd.f32 %v2954_v34, %v1075_v54  ;;  %v2999_v63 = vadd.f32 1.0, %v2414_v56  ;;  %v1564_v13 = vor.u32 1.1754944e-38, %v1563_v50  ;;  %744 = vst [vmem:[#allocation2 + $0x128] sm:$0xff] %v459_v6  ;;  %vm1559_vm6 = vmor %vm1557_vm2, %vm1558_vm3 }
  0xb9   :  { %v1550_v57 = vsel %vm2960_vm9, %v1549_v40, %v1545_v53  ;;  %v642_v59 = vpop.f32.mrf.mxu3  ;;  %v1554_v62 = vsub.f32 1.0, %v1553_v49  ;;  %v2416_v2 = vpop.eup %2415  ;;  %2421 = vpow2.f32 %v2280_v58  ;;  %vm1092_vm5 = vweird.f32 %v2946_v29 }
  0xba   :  { %2022 = vst.msk [vmem:[%s4536_s6 + $0x110] sm:$0xff] %vm1987_vm1, %v1550_v57  ;;  %v643_v3 = vadd.f32 %v2793_v18, %v642_v59  ;;  %v2418_v8 = vpop.eup %2417  ;;  %v1080_v9 = vsel %vm1079_vm15, %v2954_v34, %v1076_v55  ;;  %v1088_v11 = vmul.f32 %v2416_v2, %v2946_v29  ;;  %2423 = vrcp.f32 %v2999_v63  ;;  %v2350_v34 = vld [vmem:[%s4530_s0 + $0x60] sm:$0xff] }
  0xbb   :  { %v564_v4 = vpop.f32.mrf.mxu1  ;;  %v3010_v7 = vpop.f32.mrf.mxu2  ;;  %v1555_v10 = vmul.f32 %v2412_v47, %v1554_v62  ;;  %v1085_v1 = vsel %vm2970_vm12, %v1084_v61, %v1080_v9  ;;  %v3026_v5 = vadd.f32 1.0, %v2418_v8  ;;  %vm1093_vm7 = vweird.f32 %v2416_v2 }
  0xbc   :  { %1991 = vst.msk [vmem:[%s4536_s6 + $0x18] sm:$0xff] %vm1987_vm1, %v1085_v1  ;;  %v1089_v15 = vsub.f32 1.0, %v1088_v11  ;;  %v2420_v17 = vpop.eup %2419  ;;  %v1096_v19 = vand.u32 2147483647, %v2946_v29  ;;  %v1098_v20 = vand.u32 2147483648, %v2946_v29  ;;  %v565_v24 = vadd.f32 %v2793_v18, %v564_v4  ;;  %vm1094_vm8 = vmor %vm1092_vm5, %vm1093_vm7 }
  0xbd   :  { %v1556_v14 = vadd.f32 %v2412_v47, %v1555_v10  ;;  %v2312_v21 = vmul.f32 -1.442695, %v643_v3  ;;  %2425 = vrcp.f32 %v3026_v5  ;;  %v1576_v28 = vand.u32 2147483647, %v2999_v63  ;;  %v3064_v29 = vpop.f32.mrf.mxu0 }
  0xbe   :  { %v1090_v23 = vmul.f32 %v2416_v2, %v1089_v15  ;;  %v1578_v16 = vand.u32 2147483648, %v2999_v63  ;;  %v3042_v32 = vadd.f32 1.0, %v2420_v17  ;;  %vm1097_vm9 = vcmp.eq.f32.partialorder %v1096_v19, 8.507059e+37 }
  0xbf   :  { %v1560_v22 = vsel %vm1559_vm6, %v2412_v47, %v1556_v14  ;;  %v2422_v26 = vpop.eup %2421  ;;  %2427 = vpow2.f32 %v2312_v21  ;;  %v1099_v37 = vor.u32 1.1754944e-38, %v1098_v20  ;;  %v1111_v38 = vand.u32 2147483647, %v3026_v5 }
  0xc0   :  { %v1565_v27 = vsel %vm3016_vm4, %v1564_v13, %v1560_v22  ;;  %v1091_v31 = vadd.f32 %v2416_v2, %v1090_v23  ;;  %v3044_v33 = vadd.f32 1.0, %v2422_v26  ;;  %v2424_v36 = vpop.eup %2423  ;;  %v1113_v39 = vand.u32 2147483648, %v3026_v5 }
  0xc1   :  { %v644_v30 = vpop.f32.mrf.mxu3  ;;  %2023 = vst.msk [vmem:[%s4536_s6 + $0x118] sm:$0xff] %vm1987_vm1, %v1565_v27  ;;  %v1568_v42 = vmul.f32 %v2424_v36, %v2999_v63  ;;  %2429 = vrcp.f32 %v3042_v32  ;;  %v2281_v43 = vmul.f32 -1.442695, %v565_v24  ;;  %vm1572_vm10 = vweird.f32 %v2999_v63 }
  0xc2   :  { %v1095_v41 = vsel %vm1094_vm8, %v2416_v2, %v1091_v31  ;;  %vm3060_vm11 = vcmp.eq.f32.partialorder %v1576_v28, 8.507059e+37  ;;  %v1579_v50 = vor.u32 1.1754944e-38, %v1578_v16  ;;  %2431 = vrcp.f32 %v3044_v33 }
  0xc3   :  { %v567_v40 = vpop.f32.mrf.mxu1  ;;  %v1100_v44 = vsel %vm1097_vm9, %v1099_v37, %v1095_v41  ;;  %v3066_v46 = vpop.f32.mrf.mxu2  ;;  %v1569_v48 = vsub.f32 1.0, %v1568_v42  ;;  %v645_v51 = vadd.f32 %v2793_v18, %v644_v30  ;;  %vm1107_vm12 = vweird.f32 %v3026_v5  ;;  %v2351_v41 = vld [vmem:[%s4530_s0 + $0x68] sm:$0xff] }
  0xc4   :  { %v2426_v47 = vpop.eup %2425  ;;  %1992 = vst.msk [vmem:[%s4536_s6 + $0x20] sm:$0xff] %vm1987_vm1, %v1100_v44  ;;  %vm3078_vm13 = vcmp.eq.f32.partialorder %v1111_v38, 8.507059e+37  ;;  %v1114_v54 = vor.u32 1.1754944e-38, %v1113_v39  ;;  %vm1573_vm14 = vweird.f32 %v2424_v36  ;;  %v1591_v57 = vand.u32 2147483647, %v3042_v32  ;;  %v2367_v42 = vld [vmem:[%s4530_s0 + $0xe8] sm:$0xff] }
  0xc5   :  { %v1103_v52 = vmul.f32 %v2426_v47, %v3026_v5  ;;  %v2428_v49 = vpop.eup %2427  ;;  %v1570_v56 = vmul.f32 %v2424_v36, %v1569_v48  ;;  %2433 = vpow2.f32 %v2281_v43  ;;  %vm1587_vm15 = vweird.f32 %v3042_v32  ;;  %vm1574_vm3 = vmor %vm1572_vm10, %vm1573_vm14  ;;  %v3116_v26 = vpop.f32.mrf.mxu0 }
  0xc6   :  { %2254 = vmatmul.msk.bf16.gmra.mxu1 %vm260_vm0, %v2350_v34  ;;  %2270 = vmatmul.msk.bf16.gmra.mxu3 %vm260_vm0, %v2366_v35  ;;  %v1593_v59 = vand.u32 2147483648, %v3042_v32  ;;  %vm1122_vm2 = vweird.f32 %v3044_v33  ;;  %v3088_v60 = vadd.f32 1.0, %v2428_v49  ;;  %v1126_v2 = vand.u32 2147483647, %v3044_v33 }
  0xc7   :  { %v1104_v58 = vsub.f32 1.0, %v1103_v52  ;;  %v2430_v61 = vpop.eup %2429  ;;  %v1571_v62 = vadd.f32 %v2424_v36, %v1570_v56  ;;  %v2313_v3 = vmul.f32 -1.442695, %v645_v51  ;;  %v382_v4 = vadd.f32 %v2809_v25, %v3001_v0 }
  0xc8   :  { %2234 = vmatmul.msk.bf16.gmra.mxu2 %vm260_vm0, %v2366_v35  ;;  %2218 = vmatmul.msk.bf16.gmra.mxu0 %vm260_vm0, %v2350_v34  ;;  %vm1108_vm4 = vweird.f32 %v2426_v47  ;;  %v1583_v8 = vmul.f32 %v2430_v61, %v3042_v32  ;;  %2435 = vrcp.f32 %v3088_v60  ;;  %v2432_v10 = vpop.eup %2431  ;;  %vm3097_vm5 = vcmp.eq.f32.partialorder %v1591_v57, 8.507059e+37 }
  0xc9   :  { %v647_v55 = vpop.f32.mrf.mxu3  ;;  %v1105_v6 = vmul.f32 %v2426_v47, %v1104_v58  ;;  %v1575_v11 = vsel %vm1574_vm3, %v2424_v36, %v1571_v62  ;;  %v568_v12 = vadd.f32 %v2793_v18, %v567_v40  ;;  %713 = vst [vmem:[#allocation2 + $0x30] sm:$0xff] %v382_v4  ;;  %v1118_v15 = vmul.f32 %v2432_v10, %v3044_v33  ;;  %vm1109_vm6 = vmor %vm1107_vm12, %vm1108_vm4 }
  0xca   :  { %v648_v0 = vadd.f32 %v2793_v18, %v647_v55  ;;  %v1580_v63 = vsel %vm3060_vm11, %v1579_v50, %v1575_v11  ;;  %v1584_v14 = vsub.f32 1.0, %v1583_v8  ;;  %vm1588_vm7 = vweird.f32 %v2430_v61 }
  0xcb   :  { %v569_v9 = vpop.f32.mrf.mxu1  ;;  %v1106_v13 = vadd.f32 %v2426_v47, %v1105_v6  ;;  %v2434_v17 = vpop.eup %2433  ;;  %2024 = vst.msk [vmem:[%s4536_s6 + $0x120] sm:$0xff] %vm1987_vm1, %v1580_v63  ;;  %v1594_v19 = vor.u32 1.1754944e-38, %v1593_v59  ;;  %v1128_v20 = vand.u32 2147483648, %v3044_v33  ;;  %2437 = vpow2.f32 %v2313_v3  ;;  %vm1589_vm9 = vmor %vm1587_vm15, %vm1588_vm7 }
  0xcc   :  { %v1585_v22 = vmul.f32 %v2430_v61, %v1584_v14  ;;  %v1119_v23 = vsub.f32 1.0, %v1118_v15  ;;  %v3114_v24 = vadd.f32 1.0, %v2434_v17  ;;  %v3118_v27 = vpop.f32.mrf.mxu2  ;;  %vm1123_vm8 = vweird.f32 %v2432_v10 }
  0xcd   :  { %v1110_v21 = vsel %vm1109_vm6, %v2426_v47, %v1106_v13  ;;  %v2282_v5 = vmul.f32 -1.442695, %v568_v12  ;;  %v570_v16 = vadd.f32 %v2793_v18, %v569_v9  ;;  %v2314_v35 = vmul.f32 -1.442695, %v648_v0  ;;  %vm1124_vm11 = vmor %vm1122_vm2, %vm1123_vm8  ;;  %v3180_v59 = vpop.f32.mrf.mxu0 }
  0xce   :  { %v1115_v28 = vsel %vm3078_vm13, %v1114_v54, %v1110_v21  ;;  %v3123_v30 = vpop.eup %2435  ;;  %v1586_v31 = vadd.f32 %v2430_v61, %v1585_v22  ;;  %v1120_v34 = vmul.f32 %v2432_v10, %v1119_v23  ;;  %2439 = vrcp.f32 %v3114_v24 }
  0xcf   :  { %1993 = vst.msk [vmem:[%s4536_s6 + $0x28] sm:$0xff] %vm1987_vm1, %v1115_v28  ;;  %vm3133_vm10 = vcmp.eq.f32.partialorder %v1126_v2, 8.507059e+37  ;;  %v1129_v38 = vor.u32 1.1754944e-38, %v1128_v20  ;;  %v1598_v39 = vmul.f32 %v3123_v30, %v3088_v60  ;;  %v1606_v40 = vand.u32 2147483647, %v3088_v60 }
  0xd0   :  { %v1590_v32 = vsel %vm1589_vm9, %v2430_v61, %v1586_v31  ;;  %v1121_v43 = vadd.f32 %v2432_v10, %v1120_v34  ;;  %2441 = vpow2.f32 %v2282_v5  ;;  %v2283_v44 = vmul.f32 -1.442695, %v570_v16 }
  0xd1   :  { %v649_v36 = vpop.f32.mrf.mxu3  ;;  %v2438_v47 = vpop.eup %2437  ;;  %v1595_v48 = vsel %vm3097_vm5, %v1594_v19, %v1590_v32  ;;  %v1599_v50 = vsub.f32 1.0, %v1598_v39  ;;  %vm1603_vm12 = vweird.f32 %v3123_v30  ;;  %v1608_v51 = vand.u32 2147483648, %v3088_v60 }
  0xd2   :  { %2025 = vst.msk [vmem:[%s4536_s6 + $0x128] sm:$0xff] %vm1987_vm1, %v1595_v48  ;;  %v1125_v52 = vsel %vm1124_vm11, %v2432_v10, %v1121_v43  ;;  %v3157_v53 = vadd.f32 1.0, %v2438_v47  ;;  %2443 = vpow2.f32 %v2314_v35  ;;  %v462_v54 = vadd.f32 %v2809_v25, %v3010_v7 }
  0xd3   :  { %v572_v45 = vpop.f32.mrf.mxu1  ;;  %v1130_v33 = vsel %vm3133_vm10, %v1129_v38, %v1125_v52  ;;  %v1600_v49 = vmul.f32 %v3123_v30, %v1599_v50  ;;  %2445 = vpow2.f32 %v2283_v44  ;;  %v650_v56 = vadd.f32 %v2793_v18, %v649_v36 }
  0xd4   :  { %v3167_v57 = vpop.eup %2439  ;;  %1994 = vst.msk [vmem:[%s4536_s6 + $0x30] sm:$0xff] %vm1987_vm1, %v1130_v33  ;;  %vm1602_vm13 = vweird.f32 %v3088_v60  ;;  %vm3174_vm14 = vcmp.eq.f32.partialorder %v1606_v40, 8.507059e+37  ;;  %v1141_v58 = vand.u32 2147483647, %v3114_v24  ;;  %2447 = vrcp.f32 %v3157_v53  ;;  %v3182_v55 = vpop.f32.mrf.mxu2  ;;  %v2352_v40 = vld [vmem:[%s4530_s0 + $0x70] sm:$0xff] }
  0xd5   :  { %v1601_v61 = vadd.f32 %v3123_v30, %v1600_v49  ;;  %v1609_v62 = vor.u32 1.1754944e-38, %v1608_v51  ;;  %v1133_v60 = vmul.f32 %v3167_v57, %v3114_v24  ;;  %745 = vst [vmem:[#allocation2 + $0x130] sm:$0xff] %v462_v54  ;;  %v2315_v2 = vmul.f32 -1.442695, %v650_v56  ;;  %vm1604_vm15 = vmor %vm1602_vm13, %vm1603_vm12  ;;  %v3231_v31 = vpop.f32.mrf.mxu0 }
  0xd6   :  { %2255 = vmatmul.msk.bf16.gmra.mxu1 %vm260_vm0, %v2351_v41  ;;  %2271 = vmatmul.msk.bf16.gmra.mxu3 %vm260_vm0, %v2367_v42  ;;  %v2442_v3 = vpop.eup %2441  ;;  %vm1137_vm2 = vweird.f32 %v3114_v24  ;;  %v1143_v4 = vand.u32 2147483648, %v3114_v24  ;;  %v573_v6 = vadd.f32 %v2793_v18, %v572_v45  ;;  %v384_v8 = vadd.f32 %v2809_v25, %v3064_v29  ;;  %v2368_v45 = vld [vmem:[%s4530_s0 + $0xf0] sm:$0xff] }
  0xd7   :  { %v1605_v10 = vsel %vm1604_vm15, %v3123_v30, %v1601_v61  ;;  %v1134_v11 = vsub.f32 1.0, %v1133_v60  ;;  %v3197_v1 = vadd.f32 1.0, %v2442_v3  ;;  %2449 = vpow2.f32 %v2315_v2 }
  0xd8   :  { %2235 = vmatmul.msk.bf16.gmra.mxu2 %vm260_vm0, %v2367_v42  ;;  %2219 = vmatmul.msk.bf16.gmra.mxu0 %vm260_vm0, %v2351_v41  ;;  %v2444_v12 = vpop.eup %2443  ;;  %v1610_v0 = vsel %vm3174_vm14, %v1609_v62, %v1605_v10  ;;  %vm3201_vm3 = vcmp.eq.f32.partialorder %v1141_v58, 8.507059e+37  ;;  %v2284_v13 = vmul.f32 -1.442695, %v573_v6  ;;  %714 = vst [vmem:[#allocation2 + $0x38] sm:$0xff] %v384_v8  ;;  %v464_v29 = vadd.f32 %v2809_v25, %v3066_v46 }
  0xd9   :  { %v652_v9 = vpop.f32.mrf.mxu3  ;;  %v2446_v15 = vpop.eup %2445  ;;  %2026 = vst.msk [vmem:[%s4536_s6 + $0x130] sm:$0xff] %vm1987_vm1, %v1610_v0  ;;  %v1135_v17 = vmul.f32 %v3167_v57, %v1134_v11  ;;  %vm1138_vm4 = vweird.f32 %v3167_v57  ;;  %v1621_v19 = vand.u32 2147483647, %v3157_v53  ;;  %2451 = vrcp.f32 %v3197_v1 }
  0xda   :  { %v2448_v20 = vpop.eup %2447  ;;  %v1623_v21 = vand.u32 2147483648, %v3157_v53  ;;  %v3218_v25 = vadd.f32 1.0, %v2444_v12  ;;  %v3220_v46 = vadd.f32 1.0, %v2446_v15  ;;  %2453 = vpow2.f32 %v2284_v13  ;;  %746 = vst [vmem:[#allocation2 + $0x138] sm:$0xff] %v464_v29  ;;  %vm1139_vm6 = vmor %vm1137_vm2, %vm1138_vm4 }
  0xdb   :  { %v3207_v14 = vpop.f32.mrf.mxu1  ;;  %v1136_v22 = vadd.f32 %v3167_v57, %v1135_v17  ;;  %v1144_v23 = vor.u32 1.1754944e-38, %v1143_v4  ;;  %v1613_v28 = vmul.f32 %v2448_v20, %v3157_v53  ;;  %vm1617_vm5 = vweird.f32 %v3157_v53 }
  0xdc   :  { %v1156_v5 = vand.u32 2147483647, %v3197_v1  ;;  %v1158_v16 = vand.u32 2147483648, %v3197_v1  ;;  %2455 = vrcp.f32 %v3218_v25  ;;  %v653_v30 = vadd.f32 %v2793_v18, %v652_v9  ;;  %v3233_v34 = vpop.f32.mrf.mxu2 }
  0xdd   :  { %v2450_v35 = vpop.eup %2449  ;;  %v1140_v36 = vsel %vm1139_vm6, %v3167_v57, %v1136_v22  ;;  %v1614_v37 = vsub.f32 1.0, %v1613_v28  ;;  %vm3236_vm7 = vcmp.eq.f32.partialorder %v1621_v19, 8.507059e+37  ;;  %2457 = vrcp.f32 %v3220_v46  ;;  %v3298_v8 = vpop.f32.mrf.mxu0  ;;  %v3329_v19 = vld [vmem:[%s4534_s4] ss:$0 sm:$0xff] }
  0xde   :  { %v1145_v24 = vsel %vm3201_vm3, %v1144_v23, %v1140_v36  ;;  %vm1618_vm8 = vweird.f32 %v2448_v20  ;;  %v1624_v39 = vor.u32 1.1754944e-38, %v1623_v21  ;;  %vm1152_vm9 = vweird.f32 %v3197_v1  ;;  %v3336_v21 = vld [vmem:[%s4532_s2] ss:$0 sm:$0xff] }
  0xdf   :  { %v3249_v41 = vpop.eup %2451  ;;  %1995 = vst.msk [vmem:[%s4536_s6 + $0x38] sm:$0xff] %vm1987_vm1, %v1145_v24  ;;  %v1615_v42 = vmul.f32 %v2448_v20, %v1614_v37  ;;  %v1636_v32 = vand.u32 2147483647, %v3218_v25  ;;  %v1638_v43 = vand.u32 2147483648, %v3218_v25  ;;  %v3257_v44 = vadd.f32 1.0, %v2450_v35  ;;  %vm1619_vm11 = vmor %vm1617_vm5, %vm1618_vm8 }
  0xe0   :  { %v2454_v47 = vpop.eup %2453  ;;  %v1148_v48 = vmul.f32 %v3249_v41, %v3197_v1  ;;  %vm3264_vm10 = vcmp.eq.f32.partialorder %v1156_v5, 8.507059e+37  ;;  %v1159_v51 = vor.u32 1.1754944e-38, %v1158_v16  ;;  %v2316_v52 = vmul.f32 -1.442695, %v653_v30 }
  0xe1   :  { %v3244_v18 = vpop.f32.mrf.mxu3  ;;  %v1616_v33 = vadd.f32 %v2448_v20, %v1615_v42  ;;  %v1171_v49 = vand.u32 2147483647, %v3220_v46  ;;  %v1173_v56 = vand.u32 2147483648, %v3220_v46  ;;  %2459 = vrcp.f32 %v3257_v44 }
  0xe2   :  { %v3273_v57 = vpop.eup %2455  ;;  %v1149_v7 = vsub.f32 1.0, %v1148_v48  ;;  %vm1632_vm12 = vweird.f32 %v3218_v25  ;;  %vm1167_vm13 = vweird.f32 %v3220_v46  ;;  %v3280_v58 = vadd.f32 1.0, %v2454_v47 }
  0xe3   :  { %v3268_v54 = vpop.f32.mrf.mxu1  ;;  %v3282_v61 = vpop.eup %2457  ;;  %v1620_v62 = vsel %vm1619_vm11, %v2448_v20, %v1616_v33  ;;  %v1628_v60 = vmul.f32 %v3273_v57, %v3218_v25  ;;  %vm3286_vm14 = vcmp.eq.f32.partialorder %v1636_v32, 8.507059e+37  ;;  %v1639_v3 = vor.u32 1.1754944e-38, %v1638_v43 }
  0xe4   :  { %2461 = vpow2.f32 %v2316_v52  ;;  %v1625_v53 = vsel %vm3236_vm7, %v1624_v39, %v1620_v62  ;;  %v1150_v4 = vmul.f32 %v3249_v41, %v1149_v7  ;;  %vm1153_vm15 = vweird.f32 %v3249_v41  ;;  %v3311_v12 = vpop.f32.mrf.mxu2 }
  0xe5   :  { %v1163_v6 = vmul.f32 %v3282_v61, %v3220_v46  ;;  %2027 = vst.msk [vmem:[%s4536_s6 + $0x138] sm:$0xff] %vm1987_vm1, %v1625_v53  ;;  %v1629_v9 = vsub.f32 1.0, %v1628_v60  ;;  %vm3306_vm2 = vcmp.eq.f32.partialorder %v1171_v49, 8.507059e+37  ;;  %v1174_v11 = vor.u32 1.1754944e-38, %v1173_v56  ;;  %vm1154_vm4 = vmor %vm1152_vm9, %vm1153_vm15  ;;  %v396_v52 = vpop.f32.mrf.mxu0  ;;  %v2353_v56 = vld [vmem:[%s4530_s0 + $0x78] sm:$0xff] }
  0xe6   :  { %2256 = vmatmul.msk.bf16.gmra.mxu1 %vm260_vm0, %v2352_v40  ;;  %2272 = vmatmul.msk.bf16.gmra.mxu3 %vm260_vm0, %v2368_v45  ;;  %2463 = vrcp.f32 %v3280_v58  ;;  %v1151_v0 = vadd.f32 %v3249_v41, %v1150_v4  ;;  %vm1647_vm3 = vweird.f32 %v3257_v44  ;;  %v1651_v13 = vand.u32 2147483647, %v3257_v44  ;;  %v2369_v60 = vld [vmem:[%s4530_s0 + $0xf8] sm:$0xff] }
  0xe7   :  { %v1164_v63 = vsub.f32 1.0, %v1163_v6  ;;  %v3318_v15 = vpop.eup %2459  ;;  %v1630_v17 = vmul.f32 %v3273_v57, %v1629_v9  ;;  %vm1633_vm5 = vweird.f32 %v3273_v57  ;;  %v575_v20 = vadd.f32 %v3329_v19, %v3207_v14 }
  0xe8   :  { %2236 = vmatmul.msk.bf16.gmra.mxu2 %vm260_vm0, %v2368_v45  ;;  %2220 = vmatmul.msk.bf16.gmra.mxu0 %vm260_vm0, %v2352_v40  ;;  %v387_v1 = vadd.f32 %v3336_v21, %v3116_v26  ;;  %v1155_v22 = vsel %vm1154_vm4, %v3249_v41, %v1151_v0  ;;  %vm1168_vm6 = vweird.f32 %v3282_v61  ;;  %v1643_v28 = vmul.f32 %v3318_v15, %v3257_v44  ;;  %vm1634_vm8 = vmor %vm1632_vm12, %vm1633_vm5 }
  0xe9   :  { %v3316_v29 = vpop.f32.mrf.mxu3  ;;  %v1165_v23 = vmul.f32 %v3282_v61, %v1164_v63  ;;  %v1160_v14 = vsel %vm3264_vm10, %v1159_v51, %v1155_v22  ;;  %v1631_v30 = vadd.f32 %v3273_v57, %v1630_v17  ;;  %vm1648_vm7 = vweird.f32 %v3318_v15  ;;  %vm1169_vm9 = vmor %vm1167_vm13, %vm1168_vm6 }
  0xea   :  { %v2462_v16 = vpop.eup %2461  ;;  %v1653_v26 = vand.u32 2147483648, %v3257_v44  ;;  %715 = vst [vmem:[#allocation2 + $0x40] sm:$0xff] %v387_v1  ;;  %v1644_v36 = vsub.f32 1.0, %v1643_v28  ;;  %v2285_v38 = vmul.f32 -1.442695, %v575_v20  ;;  %v467_v40 = vadd.f32 %v3336_v21, %v3118_v27  ;;  %vm1649_vm12 = vmor %vm1647_vm3, %vm1648_vm7 }
  0xeb   :  { %v579_v5 = vpop.f32.mrf.mxu1  ;;  %1996 = vst.msk [vmem:[%s4536_s6 + $0x40] sm:$0xff] %vm1987_vm1, %v1160_v14  ;;  %v1166_v35 = vadd.f32 %v3282_v61, %v1165_v23  ;;  %v3359_v37 = vadd.f32 1.0, %v2462_v16  ;;  %v1635_v39 = vsel %vm1634_vm8, %v3273_v57, %v1631_v30  ;;  %v655_v25 = vadd.f32 %v3329_v19, %v3244_v18 }
  0xec   :  { %v3361_v24 = vpop.eup %2463  ;;  %v578_v41 = vadd.f32 %v3329_v19, %v3268_v54  ;;  %v1640_v42 = vsel %vm3286_vm14, %v1639_v3, %v1635_v39  ;;  %v1645_v43 = vmul.f32 %v3318_v15, %v1644_v36  ;;  %vm3386_vm10 = vcmp.eq.f32.partialorder %v1651_v13, 8.507059e+37  ;;  %747 = vst [vmem:[#allocation2 + $0x140] sm:$0xff] %v467_v40  ;;  %v3407_v57 = vpop.f32.mrf.mxu2 }
  0xed   :  { %v1170_v32 = vsel %vm1169_vm9, %v3282_v61, %v1166_v35  ;;  %v1178_v46 = vmul.f32 %v3361_v24, %v3280_v58  ;;  %2028 = vst.msk [vmem:[%s4536_s6 + $0x140] sm:$0xff] %vm1987_vm1, %v1640_v42  ;;  %v1654_v45 = vor.u32 1.1754944e-38, %v1653_v26  ;;  %2465 = vrcp.f32 %v3359_v37  ;;  %v3461_v28 = vpop.f32.mrf.mxu0 }
  0xee   :  { %v1175_v27 = vsel %vm3306_vm2, %v1174_v11, %v1170_v32  ;;  %v1646_v47 = vadd.f32 %v3318_v15, %v1645_v43  ;;  %vm1182_vm11 = vweird.f32 %v3280_v58  ;;  %v1188_v50 = vand.u32 2147483648, %v3280_v58 }
  0xef   :  { %1997 = vst.msk [vmem:[%s4536_s6 + $0x48] sm:$0xff] %vm1987_vm1, %v1175_v27  ;;  %v1179_v48 = vsub.f32 1.0, %v1178_v46  ;;  %2467 = vpow2.f32 %v2285_v38  ;;  %v2317_v54 = vmul.f32 -1.442695, %v655_v25  ;;  %v2286_v33 = vmul.f32 -1.442695, %v578_v41 }
  0xf0   :  { %v389_v49 = vadd.f32 %v3336_v21, %v3180_v59  ;;  %v1650_v7 = vsel %vm1649_vm12, %v3318_v15, %v1646_v47  ;;  %vm1183_vm13 = vweird.f32 %v3361_v24  ;;  %v1186_v44 = vand.u32 2147483647, %v3280_v58 }
  0xf1   :  { %v659_v51 = vpop.f32.mrf.mxu3  ;;  %v1180_v61 = vmul.f32 %v3361_v24, %v1179_v48  ;;  %v1655_v59 = vsel %vm3386_vm10, %v1654_v45, %v1650_v7  ;;  %2469 = vpow2.f32 %v2317_v54  ;;  %v469_v2 = vadd.f32 %v3336_v21, %v3182_v55  ;;  %vm3436_vm14 = vmor %vm1182_vm11, %vm1183_vm13 }
  0xf2   :  { %716 = vst [vmem:[#allocation2 + $0x48] sm:$0xff] %v389_v49  ;;  %v658_v3 = vadd.f32 %v3329_v19, %v3316_v29  ;;  %2471 = vpow2.f32 %v2286_v33  ;;  %v580_v4 = vadd.f32 %v3329_v19, %v579_v5  ;;  %v392_v6 = vadd.f32 %v3336_v21, %v3231_v31 }
  0xf3   :  { %v582_v62 = vpop.f32.mrf.mxu1  ;;  %2029 = vst.msk [vmem:[%s4536_s6 + $0x148] sm:$0xff] %vm1987_vm1, %v1655_v59  ;;  %v1181_v53 = vadd.f32 %v3361_v24, %v1180_v61  ;;  %v3430_v9 = vpop.eup %2465  ;;  %v1189_v10 = vor.u32 1.1754944e-38, %v1188_v50  ;;  %v472_v0 = vadd.f32 %v3336_v21, %v3233_v34  ;;  %v660_v63 = vadd.f32 %v3329_v19, %v659_v51 }
  0xf4   :  { %748 = vst [vmem:[#allocation2 + $0x148] sm:$0xff] %v469_v2  ;;  %v2318_v11 = vmul.f32 -1.442695, %v658_v3  ;;  %vm1187_vm15 = vcmp.eq.f32.partialorder %v1186_v44, 8.507059e+37  ;;  %v1658_v58 = vmul.f32 %v3430_v9, %v3359_v37  ;;  %v2287_v13 = vmul.f32 -1.442695, %v580_v4  ;;  %v3467_v26 = vpop.f32.mrf.mxu2 }
  0xf5   :  { %v1185_v31 = vsel %vm3436_vm14, %v3361_v24, %v1181_v53  ;;  %717 = vst [vmem:[#allocation2 + $0x50] sm:$0xff] %v392_v6  ;;  %v2468_v29 = vpop.eup %2467  ;;  %v2319_v15 = vmul.f32 -1.442695, %v660_v63  ;;  %v583_v17 = vadd.f32 %v3329_v19, %v582_v62  ;;  %v394_v22 = vadd.f32 %v3336_v21, %v3298_v8  ;;  %v3498_v54 = vpop.f32.mrf.mxu0 }
  0xf6   :  { %2257 = vmatmul.msk.bf16.gmra.mxu1 %vm260_vm0, %v2353_v56  ;;  %2273 = vmatmul.msk.bf16.gmra.mxu3 %vm260_vm0, %v2369_v60  ;;  %v1190_v34 = vsel %vm1187_vm15, %v1189_v10, %v1185_v31  ;;  %2473 = vpow2.f32 %v2318_v11  ;;  %749 = vst [vmem:[#allocation2 + $0x150] sm:$0xff] %v472_v0  ;;  %v1659_v20 = vsub.f32 1.0, %v1658_v58  ;;  %v3457_v1 = vadd.f32 1.0, %v2468_v29 }
  0xf7   :  { %1998 = vst.msk [vmem:[%s4536_s6 + $0x50] sm:$0xff] %vm1987_vm1, %v1190_v34  ;;  %2475 = vpow2.f32 %v2287_v13  ;;  %v2470_v5 = vpop.eup %2469  ;;  %v1668_v16 = vand.u32 2147483648, %v3359_v37  ;;  %v474_v14 = vadd.f32 %v3336_v21, %v3311_v12  ;;  %v397_v30 = vadd.f32 %v3336_v21, %v396_v52 }
  0xf8   :  { %2237 = vmatmul.msk.bf16.gmra.mxu2 %vm260_vm0, %v2369_v60  ;;  %2221 = vmatmul.msk.bf16.gmra.mxu0 %vm260_vm0, %v2353_v56  ;;  %2477 = vpow2.f32 %v2319_v15  ;;  %v2472_v35 = vpop.eup %2471  ;;  %v1660_v36 = vmul.f32 %v3430_v9, %v1659_v20  ;;  %vm1663_vm0 = vweird.f32 %v3430_v9  ;;  %v1666_v8 = vand.u32 2147483647, %v3359_v37  ;;  %718 = vst [vmem:[#allocation2 + $0x58] sm:$0xff] %v394_v22 }
  0xf9   :  { %v662_v23 = vpop.f32.mrf.mxu3  ;;  %2479 = vrcp.f32 %v3457_v1  ;;  %v3473_v24 = vadd.f32 1.0, %v2470_v5  ;;  %v3475_v39 = vadd.f32 1.0, %v2472_v35  ;;  %v2288_v12 = vmul.f32 -1.442695, %v583_v17  ;;  %750 = vst [vmem:[#allocation2 + $0x158] sm:$0xff] %v474_v14 }
  0xfa   :  { %v1661_v40 = vadd.f32 %v3430_v9, %v1660_v36  ;;  %vm1662_vm2 = vweird.f32 %v3359_v37  ;;  %719 = vst [vmem:[#allocation2 + $0x60] sm:$0xff] %v397_v30  ;;  %v1669_v41 = vor.u32 1.1754944e-38, %v1668_v16  ;;  %v1201_v42 = vand.u32 2147483647, %v3457_v1 }
  0xfb   :  { %v584_v38 = vpop.f32.mrf.mxu1  ;;  %vm1664_vm3 = vmor %vm1662_vm2, %vm1663_vm0  ;;  %2481 = vrcp.f32 %v3473_v24  ;;  %v663_v32 = vadd.f32 %v3329_v19, %v662_v23  ;;  %vm1667_vm4 = vcmp.eq.f32.partialorder %v1666_v8, 8.507059e+37  ;;  %v1203_v27 = vand.u32 2147483648, %v3457_v1 }
  0xfc   :  { %v2474_v25 = vpop.eup %2473  ;;  %v1665_v46 = vsel %vm1664_vm3, %v3430_v9, %v1661_v40  ;;  %2483 = vrcp.f32 %v3475_v39  ;;  %vm1197_vm5 = vweird.f32 %v3457_v1  ;;  %v1681_v47 = vand.u32 2147483647, %v3473_v24  ;;  %v3509_v44 = vpop.f32.mrf.mxu2 }
  0xfd   :  { %v2476_v43 = vpop.eup %2475  ;;  %v1670_v37 = vsel %vm1667_vm4, %v1669_v41, %v1665_v46  ;;  %2485 = vpow2.f32 %v2288_v12  ;;  %v1683_v48 = vand.u32 2147483648, %v3473_v24  ;;  %v3492_v50 = vadd.f32 1.0, %v2474_v25 }
  0xfe   :  { %v2478_v18 = vpop.eup %2477  ;;  %2030 = vst.msk [vmem:[%s4536_s6 + $0x150] sm:$0xff] %vm1987_vm1, %v1670_v37  ;;  %v3494_v51 = vadd.f32 1.0, %v2476_v43  ;;  %vm3501_vm6 = vcmp.eq.f32.partialorder %v1201_v42, 8.507059e+37  ;;  %v1216_v56 = vand.u32 2147483647, %v3475_v39  ;;  %v3507_v61 = vadd.f32 %v3329_v19, %v584_v38 }
  0xff   :  { %v2480_v45 = vpop.eup %2479  ;;  %v2320_v7 = vmul.f32 -1.442695, %v663_v32  ;;  %v1204_v62 = vor.u32 1.1754944e-38, %v1203_v27  ;;  %v1218_v60 = vand.u32 2147483648, %v3475_v39  ;;  %2487 = vrcp.f32 %v3492_v50  ;;  %v3570_v32 = vpop.f32.mrf.mxu0 }
 0x100   :  { %v1193_v33 = vmul.f32 %v2480_v45, %v3457_v1  ;;  %v3513_v59 = vadd.f32 1.0, %v2478_v18  ;;  %vm1677_vm7 = vweird.f32 %v3473_v24  ;;  %vm1212_vm8 = vweird.f32 %v3475_v39 }
 0x101   :  { %v3496_v52 = vpop.f32.mrf.mxu3  ;;  %v2482_v3 = vpop.eup %2481  ;;  %2489 = vrcp.f32 %v3494_v51  ;;  %vm1198_vm9 = vweird.f32 %v2480_v45  ;;  %vm3523_vm10 = vcmp.eq.f32.partialorder %v1681_v47, 8.507059e+37  ;;  %v1684_v55 = vor.u32 1.1754944e-38, %v1683_v48 }
 0x102   :  { %v1194_v53 = vsub.f32 1.0, %v1193_v33  ;;  %v3520_v4 = vpop.eup %2483  ;;  %v1673_v6 = vmul.f32 %v2482_v3, %v3473_v24  ;;  %v1698_v10 = vand.u32 2147483648, %v3492_v50  ;;  %vm3530_vm11 = vcmp.eq.f32.partialorder %v1216_v56, 8.507059e+37  ;;  %vm1199_vm14 = vmor %vm1197_vm5, %vm1198_vm9 }
 0x103   :  { %v3515_v2 = vpop.f32.mrf.mxu1  ;;  %v2486_v11 = vpop.eup %2485  ;;  %v1208_v63 = vmul.f32 %v3520_v4, %v3475_v39  ;;  %v1696_v58 = vand.u32 2147483647, %v3492_v50  ;;  %v1219_v29 = vor.u32 1.1754944e-38, %v1218_v60  ;;  %v1231_v34 = vand.u32 2147483647, %v3494_v51 }
 0x104   :  { %v1195_v0 = vmul.f32 %v2480_v45, %v1194_v53  ;;  %v1674_v13 = vsub.f32 1.0, %v1673_v6  ;;  %2491 = vrcp.f32 %v3513_v59  ;;  %vm1678_vm12 = vweird.f32 %v2482_v3  ;;  %v3582_v37 = vpop.f32.mrf.mxu2 }
 0x105   :  { %v1209_v17 = vsub.f32 1.0, %v1208_v63  ;;  %vm1692_vm13 = vweird.f32 %v3492_v50  ;;  %v1233_v20 = vand.u32 2147483648, %v3494_v51  ;;  %v3539_v22 = vpop.eup %2487  ;;  %v1699_v5 = vor.u32 1.1754944e-38, %v1698_v10  ;;  %vm1679_vm4 = vmor %vm1677_vm7, %vm1678_vm12 }
 0x106   :  { %v1196_v15 = vadd.f32 %v2480_v45, %v1195_v0  ;;  %v1675_v23 = vmul.f32 %v2482_v3, %v1674_v13  ;;  %vm1227_vm15 = vweird.f32 %v3494_v51  ;;  %v3545_v16 = vadd.f32 1.0, %v2486_v11 }
 0x107   :  { %2493 = vpow2.f32 %v2320_v7  ;;  %v3549_v30 = vpop.eup %2489  ;;  %v1210_v36 = vmul.f32 %v3520_v4, %v1209_v17  ;;  %vm1213_vm0 = vweird.f32 %v3520_v4  ;;  %v1688_v1 = vmul.f32 %v3539_v22, %v3492_v50 }
 0x108   :  { %v1200_v35 = vsel %vm1199_vm14, %v2480_v45, %v1196_v15  ;;  %vm3555_vm2 = vcmp.eq.f32.partialorder %v1696_v58, 8.507059e+37  ;;  %v1676_v12 = vadd.f32 %v2482_v3, %v1675_v23  ;;  %v1223_v40 = vmul.f32 %v3549_v30, %v3494_v51  ;;  %v3653_v23 = vpop.f32.mrf.mxu0 }
 0x109   :  { %v3547_v14 = vpop.f32.mrf.mxu3  ;;  %v1205_v38 = vsel %vm3501_vm6, %v1204_v62, %v1200_v35  ;;  %vm3563_vm3 = vcmp.eq.f32.partialorder %v1231_v34, 8.507059e+37  ;;  %v1711_v41 = vand.u32 2147483647, %v3513_v59  ;;  %v1211_v43 = vadd.f32 %v3520_v4, %v1210_v36  ;;  %vm1214_vm6 = vmor %vm1212_vm8, %vm1213_vm0 }
 0x10a   :  { %1999 = vst.msk [vmem:[%s4536_s6 + $0x58] sm:$0xff] %vm1987_vm1, %v1205_v38  ;;  %v1689_v46 = vsub.f32 1.0, %v1688_v1  ;;  %v1234_v27 = vor.u32 1.1754944e-38, %v1233_v20  ;;  %vm1707_vm5 = vweird.f32 %v3513_v59  ;;  %v1713_v18 = vand.u32 2147483648, %v3513_v59  ;;  %v2492_v45 = vpop.eup %2491 }
 0x10b   :  { %v3568_v42 = vpop.f32.mrf.mxu1  ;;  %v1680_v47 = vsel %vm1679_vm4, %v2482_v3, %v1676_v12  ;;  %vm1693_vm9 = vweird.f32 %v3539_v22  ;;  %v1224_v24 = vsub.f32 1.0, %v1223_v40  ;;  %2495 = vrcp.f32 %v3545_v16 }
 0x10c   :  { %v1685_v48 = vsel %vm3523_vm10, %v1684_v55, %v1680_v47  ;;  %v1215_v33 = vsel %vm1214_vm6, %v3520_v4, %v1211_v43  ;;  %v1690_v49 = vmul.f32 %v3539_v22, %v1689_v46  ;;  %v1703_v56 = vmul.f32 %v2492_v45, %v3513_v59  ;;  %vm1694_vm8 = vmor %vm1692_vm13, %vm1693_vm9  ;;  %v3659_v1 = vpop.f32.mrf.mxu2 }
 0x10d   :  { %v2494_v7 = vpop.eup %2493  ;;  %2031 = vst.msk [vmem:[%s4536_s6 + $0x158] sm:$0xff] %vm1987_vm1, %v1685_v48  ;;  %v1220_v39 = vsel %vm3530_vm11, %v1219_v29, %v1215_v33  ;;  %v1225_v62 = vmul.f32 %v3549_v30, %v1224_v24  ;;  %vm1228_vm7 = vweird.f32 %v3549_v30  ;;  %v1246_v60 = vand.u32 2147483647, %v3545_v16 }
 0x10e   :  { %2000 = vst.msk [vmem:[%s4536_s6 + $0x60] sm:$0xff] %vm1987_vm1, %v1220_v39  ;;  %v1691_v3 = vadd.f32 %v3539_v22, %v1690_v49  ;;  %v1704_v53 = vsub.f32 1.0, %v1703_v56  ;;  %v1248_v4 = vand.u32 2147483648, %v3545_v16  ;;  %v3610_v6 = vadd.f32 1.0, %v2494_v7  ;;  %vm1229_vm11 = vmor %vm1227_vm15, %vm1228_vm7 }
 0x10f   :  { %v1226_v9 = vadd.f32 %v3549_v30, %v1225_v62  ;;  %vm3617_vm10 = vcmp.eq.f32.partialorder %v1711_v41, 8.507059e+37  ;;  %v2289_v10 = vmul.f32 -1.442695, %v3507_v61  ;;  %v477_v11 = vadd.f32 %v3336_v21, %v3407_v57 }
 0x110   :  { %v1695_v63 = vsel %vm1694_vm8, %v3539_v22, %v1691_v3  ;;  %v1705_v31 = vmul.f32 %v2492_v45, %v1704_v53  ;;  %vm1708_vm12 = vweird.f32 %v2492_v45  ;;  %2497 = vrcp.f32 %v3610_v6 }
 0x111   :  { %v669_v0 = vpop.f32.mrf.mxu3  ;;  %v2496_v50 = vpop.eup %2495  ;;  %v1700_v58 = vsel %vm3555_vm2, %v1699_v5, %v1695_v63  ;;  %v1230_v13 = vsel %vm1229_vm11, %v3549_v30, %v1226_v9  ;;  %v1714_v61 = vor.u32 1.1754944e-38, %v1713_v18  ;;  %vm1242_vm13 = vweird.f32 %v3545_v16  ;;  %751 = vst [vmem:[#allocation2 + $0x160] sm:$0xff] %v477_v11  ;;  %vm1709_vm15 = vmor %vm1707_vm5, %vm1708_vm12 }
 0x112   :  { %2032 = vst.msk [vmem:[%s4536_s6 + $0x160] sm:$0xff] %vm1987_vm1, %v1700_v58  ;;  %v1235_v51 = vsel %vm3563_vm3, %v1234_v27, %v1230_v13  ;;  %v1706_v29 = vadd.f32 %v2492_v45, %v1705_v31  ;;  %v1238_v34 = vmul.f32 %v2496_v50, %v3545_v16  ;;  %vm3639_vm14 = vcmp.eq.f32.partialorder %v1246_v60, 8.507059e+37 }
 0x113   :  { %v592_v57 = vpop.f32.mrf.mxu1  ;;  %v1249_v17 = vor.u32 1.1754944e-38, %v1248_v4  ;;  %2001 = vst.msk [vmem:[%s4536_s6 + $0x68] sm:$0xff] %vm1987_vm1, %v1235_v51  ;;  %vm1243_vm0 = vweird.f32 %v2496_v50  ;;  %v1726_v20 = vand.u32 2147483647, %v3610_v6  ;;  %2499 = vpow2.f32 %v2289_v10 }
 0x114   :  { %v665_v22 = vadd.f32 %v3329_v19, %v3496_v52  ;;  %v1710_v5 = vsel %vm1709_vm15, %v2492_v45, %v1706_v29  ;;  %v1239_v30 = vsub.f32 1.0, %v1238_v34  ;;  %v588_v35 = vadd.f32 %v3329_v19, %v3515_v2  ;;  %vm1244_vm3 = vmor %vm1242_vm13, %vm1243_vm0  ;;  %v3706_v9 = vpop.f32.mrf.mxu2 }
 0x115   :  { %v399_v36 = vadd.f32 %v3336_v21, %v3461_v28  ;;  %v1715_v59 = vsel %vm3617_vm10, %v1714_v61, %v1710_v5  ;;  %v1728_v8 = vand.u32 2147483648, %v3610_v6  ;;  %v479_v52 = vadd.f32 %v3336_v21, %v3467_v26 }
 0x116   :  { %v2321_v38 = vmul.f32 -1.442695, %v665_v22  ;;  %v2498_v12 = vpop.eup %2497  ;;  %2033 = vst.msk [vmem:[%s4536_s6 + $0x168] sm:$0xff] %vm1987_vm1, %v1715_v59  ;;  %v1240_v2 = vmul.f32 %v2496_v50, %v1239_v30  ;;  %v2290_v40 = vmul.f32 -1.442695, %v588_v35  ;;  %v668_v28 = vadd.f32 %v3329_v19, %v3547_v14 }
 0x117   :  { %v590_v25 = vadd.f32 %v3329_v19, %v3568_v42  ;;  %v1718_v41 = vmul.f32 %v2498_v12, %v3610_v6  ;;  %vm1723_vm2 = vweird.f32 %v2498_v12  ;;  %720 = vst [vmem:[#allocation2 + $0x68] sm:$0xff] %v399_v36  ;;  %v402_v26 = vadd.f32 %v3336_v21, %v3498_v54 }
 0x118   :  { %2501 = vpow2.f32 %v2321_v38  ;;  %v1241_v46 = vadd.f32 %v2496_v50, %v1240_v2  ;;  %752 = vst [vmem:[#allocation2 + $0x168] sm:$0xff] %v479_v52  ;;  %v2322_v27 = vmul.f32 -1.442695, %v668_v28  ;;  %v482_v42 = vadd.f32 %v3336_v21, %v3509_v44  ;;  %v3698_v44 = vpop.f32.mrf.mxu0 }
 0x119   :  { %v3677_v43 = vpop.f32.mrf.mxu3  ;;  %2503 = vpow2.f32 %v2290_v40  ;;  %v2291_v18 = vmul.f32 -1.442695, %v590_v25  ;;  %v2500_v45 = vpop.eup %2499  ;;  %v1719_v14 = vsub.f32 1.0, %v1718_v41  ;;  %721 = vst [vmem:[#allocation2 + $0x70] sm:$0xff] %v402_v26  ;;  %v670_v47 = vadd.f32 %v3329_v19, %v669_v0 }
 0x11a   :  { %v593_v54 = vadd.f32 %v3329_v19, %v592_v57  ;;  %v1245_v48 = vsel %vm1244_vm3, %v2496_v50, %v1241_v46  ;;  %v3686_v33 = vadd.f32 1.0, %v2500_v45  ;;  %2505 = vpow2.f32 %v2322_v27  ;;  %753 = vst [vmem:[#allocation2 + $0x170] sm:$0xff] %v482_v42 }
 0x11b   :  { %v594_v24 = vpop.f32.mrf.mxu1  ;;  %v404_v49 = vadd.f32 %v3336_v21, %v3570_v32  ;;  %v1250_v16 = vsel %vm3639_vm14, %v1249_v17, %v1245_v48  ;;  %v1720_v56 = vmul.f32 %v2498_v12, %v1719_v14  ;;  %2507 = vpow2.f32 %v2291_v18 }
 0x11c   :  { %v2323_v7 = vmul.f32 -1.442695, %v670_v47  ;;  %2002 = vst.msk [vmem:[%s4536_s6 + $0x70] sm:$0xff] %vm1987_vm1, %v1250_v16  ;;  %vm1722_vm4 = vweird.f32 %v3610_v6  ;;  %2509 = vrcp.f32 %v3686_v33  ;;  %v2292_v62 = vmul.f32 -1.442695, %v593_v54  ;;  %v3769_v14 = vpop.f32.mrf.mxu2 }
 0x11d   :  { %v1721_v32 = vadd.f32 %v2498_v12, %v1720_v56  ;;  %722 = vst [vmem:[#allocation2 + $0x78] sm:$0xff] %v404_v49  ;;  %v484_v60 = vadd.f32 %v3336_v21, %v3582_v37  ;;  %vm1724_vm5 = vmor %vm1722_vm4, %vm1723_vm2  ;;  %vm1727_vm6 = vcmp.eq.f32.partialorder %v1726_v20, 8.507059e+37  ;;  %v1729_v53 = vor.u32 1.1754944e-38, %v1728_v8 }
 0x11e   :  { %v2502_v39 = vpop.eup %2501  ;;  %2511 = vpow2.f32 %v2323_v7  ;;  %v1261_v4 = vand.u32 2147483647, %v3686_v33  ;;  %v1263_v10 = vand.u32 2147483648, %v3686_v33  ;;  %vm1257_vm9 = vweird.f32 %v3686_v33 }
 0x11f   :  { %v2504_v3 = vpop.eup %2503  ;;  %v3704_v6 = vadd.f32 1.0, %v2502_v39  ;;  %v1725_v55 = vsel %vm1724_vm5, %v2498_v12, %v1721_v32  ;;  %2513 = vpow2.f32 %v2292_v62  ;;  %754 = vst [vmem:[#allocation2 + $0x178] sm:$0xff] %v484_v60  ;;  %v3738_v5 = vadd.f32 %v3329_v19, %v3677_v43 }
 0x120   :  { %v3709_v11 = vadd.f32 1.0, %v2504_v3  ;;  %v2506_v37 = vpop.eup %2505  ;;  %v1730_v63 = vsel %vm1727_vm6, %v1729_v53, %v1725_v55  ;;  %vm3727_vm7 = vcmp.eq.f32.partialorder %v1261_v4, 8.507059e+37  ;;  %v1264_v34 = vor.u32 1.1754944e-38, %v1263_v10  ;;  %v3749_v52 = vpop.f32.mrf.mxu0 }
 0x121   :  { %v3711_v0 = vpop.f32.mrf.mxu3  ;;  %2515 = vrcp.f32 %v3704_v6  ;;  %v2508_v31 = vpop.eup %2507  ;;  %2034 = vst.msk [vmem:[%s4536_s6 + $0x170] sm:$0xff] %vm1987_vm1, %v1730_v63  ;;  %v3722_v13 = vadd.f32 1.0, %v2506_v37  ;;  %v1741_v15 = vand.u32 2147483647, %v3704_v6  ;;  %v1743_v17 = vand.u32 2147483648, %v3704_v6 }
 0x122   :  { %2517 = vrcp.f32 %v3709_v11  ;;  %v2510_v58 = vpop.eup %2509  ;;  %v3724_v61 = vadd.f32 1.0, %v2508_v31  ;;  %v1276_v20 = vand.u32 2147483647, %v3709_v11  ;;  %v1278_v22 = vand.u32 2147483648, %v3709_v11 }
 0x123   :  { %v3719_v50 = vpop.f32.mrf.mxu1  ;;  %v1253_v51 = vmul.f32 %v2510_v58, %v3686_v33  ;;  %2519 = vrcp.f32 %v3722_v13  ;;  %vm1737_vm8 = vweird.f32 %v3704_v6  ;;  %v3743_v36 = vadd.f32 %v3329_v19, %v594_v24 }
 0x124   :  { %v2512_v57 = vpop.eup %2511  ;;  %2521 = vrcp.f32 %v3724_v61  ;;  %vm1258_vm10 = vweird.f32 %v2510_v58  ;;  %vm1272_vm11 = vweird.f32 %v3709_v11  ;;  %v1758_v8 = vand.u32 2147483648, %v3722_v13 }
 0x125   :  { %v2514_v30 = vpop.eup %2513  ;;  %v1254_v35 = vsub.f32 1.0, %v1253_v51  ;;  %v3747_v38 = vadd.f32 1.0, %v2512_v57  ;;  %vm3754_vm12 = vcmp.eq.f32.partialorder %v1741_v15, 8.507059e+37  ;;  %v1744_v25 = vor.u32 1.1754944e-38, %v1743_v17  ;;  %vm1259_vm0 = vmor %vm1257_vm9, %vm1258_vm10 }
 0x126   :  { %v1756_v41 = vand.u32 2147483647, %v3722_v13  ;;  %vm3763_vm13 = vcmp.eq.f32.partialorder %v1276_v20, 8.507059e+37  ;;  %v1279_v27 = vor.u32 1.1754944e-38, %v1278_v22  ;;  %v1291_v18 = vand.u32 2147483647, %v3724_v61 }
 0x127   :  { %v2516_v59 = vpop.eup %2515  ;;  %v1255_v2 = vmul.f32 %v2510_v58, %v1254_v35  ;;  %v1293_v45 = vand.u32 2147483648, %v3724_v61  ;;  %vm1752_vm15 = vweird.f32 %v3722_v13  ;;  %2523 = vrcp.f32 %v3747_v38 }
 0x128   :  { %v3751_v12 = vpop.eup %2517  ;;  %v1733_v40 = vmul.f32 %v2516_v59, %v3704_v6  ;;  %vm1738_vm14 = vweird.f32 %v2516_v59  ;;  %v1759_v49 = vor.u32 1.1754944e-38, %v1758_v8  ;;  %vm1287_vm3 = vweird.f32 %v3724_v61  ;;  %v3824_v35 = vpop.f32.mrf.mxu0 }
 0x129   :  { %v3759_v26 = vpop.f32.mrf.mxu3  ;;  %v1268_v43 = vmul.f32 %v3751_v12, %v3709_v11  ;;  %v1256_v42 = vadd.f32 %v2510_v58, %v1255_v2  ;;  %v3775_v24 = vpop.eup %2519  ;;  %vm1273_vm2 = vweird.f32 %v3751_v12  ;;  %v3782_v16 = vadd.f32 1.0, %v2514_v30  ;;  %vm1739_vm6 = vmor %vm1737_vm8, %vm1738_vm14 }
 0x12a   :  { %v1734_v47 = vsub.f32 1.0, %v1733_v40  ;;  %v2522_v56 = vpop.eup %2521  ;;  %v1748_v32 = vmul.f32 %v3775_v24, %v3722_v13  ;;  %vm3786_vm4 = vcmp.eq.f32.partialorder %v1756_v41, 8.507059e+37  ;;  %v1773_v33 = vand.u32 2147483648, %v3747_v38  ;;  %vm1274_vm10 = vmor %vm1272_vm11, %vm1273_vm2 }
 0x12b   :  { %v3773_v54 = vpop.f32.mrf.mxu1  ;;  %v1269_v48 = vsub.f32 1.0, %v1268_v43  ;;  %v1260_v7 = vsel %vm1259_vm0, %v2510_v58, %v1256_v42  ;;  %v1283_v53 = vmul.f32 %v2522_v56, %v3724_v61  ;;  %v1771_v4 = vand.u32 2147483647, %v3747_v38 }
 0x12c   :  { %v1735_v39 = vmul.f32 %v2516_v59, %v1734_v47  ;;  %v1265_v60 = vsel %vm3727_vm7, %v1264_v34, %v1260_v7  ;;  %v1749_v10 = vsub.f32 1.0, %v1748_v32  ;;  %vm3800_vm5 = vcmp.eq.f32.partialorder %v1291_v18, 8.507059e+37 }
 0x12d   :  { %v1270_v3 = vmul.f32 %v3751_v12, %v1269_v48  ;;  %2003 = vst.msk [vmem:[%s4536_s6 + $0x78] sm:$0xff] %vm1987_vm1, %v1265_v60  ;;  %v1294_v63 = vor.u32 1.1754944e-38, %v1293_v45  ;;  %vm1753_vm9 = vweird.f32 %v3775_v24  ;;  %v1284_v58 = vsub.f32 1.0, %v1283_v53  ;;  %v2524_v57 = vpop.eup %2523 }
 0x12e   :  { %v1736_v55 = vadd.f32 %v2516_v59, %v1735_v39  ;;  %vm1767_vm7 = vweird.f32 %v3747_v38  ;;  %2525 = vrcp.f32 %v3782_v16  ;;  %v1750_v29 = vmul.f32 %v3775_v24, %v1749_v10 }
 0x12f   :  { %v1271_v31 = vadd.f32 %v3751_v12, %v1270_v3  ;;  %vm1288_vm0 = vweird.f32 %v2522_v56  ;;  %v1774_v6 = vor.u32 1.1754944e-38, %v1773_v33  ;;  %v1285_v20 = vmul.f32 %v2522_v56, %v1284_v58 }
 0x130   :  { %v1740_v51 = vsel %vm1739_vm6, %v2516_v59, %v1736_v55  ;;  %v1763_v22 = vmul.f32 %v2524_v57, %v3747_v38  ;;  %vm3820_vm8 = vcmp.eq.f32.partialorder %v1771_v4, 8.507059e+37  ;;  %v1751_v59 = vadd.f32 %v3775_v24, %v1750_v29  ;;  %vm1289_vm14 = vmor %vm1287_vm3, %vm1288_vm0  ;;  %v416_v3 = vpop.f32.mrf.mxu0 }
 0x131   :  { %v679_v34 = vpop.f32.mrf.mxu3  ;;  %v1745_v15 = vsel %vm3754_vm12, %v1744_v25, %v1740_v51  ;;  %v1275_v17 = vsel %vm1274_vm10, %v3751_v12, %v1271_v31  ;;  %vm1302_vm11 = vweird.f32 %v3782_v16  ;;  %v1306_v8 = vand.u32 2147483647, %v3782_v16  ;;  %vm1754_vm12 = vmor %vm1752_vm15, %vm1753_vm9  ;;  %v3845_v25 = vpop.f32.mrf.mxu2 }
 0x132   :  { %2035 = vst.msk [vmem:[%s4536_s6 + $0x178] sm:$0xff] %vm1987_vm1, %v1745_v15  ;;  %v1280_v11 = vsel %vm3763_vm13, %v1279_v27, %v1275_v17  ;;  %v1308_v12 = vand.u32 2147483648, %v3782_v16  ;;  %v1286_v2 = vadd.f32 %v2522_v56, %v1285_v20  ;;  %v1764_v40 = vsub.f32 1.0, %v1763_v22 }
 0x133   :  { %2004 = vst.msk [vmem:[%s4536_s6 + $0x80] sm:$0xff] %vm1987_vm1, %v1280_v11  ;;  %vm1768_vm13 = vweird.f32 %v2524_v57  ;;  %v2324_v28 = vmul.f32 -1.442695, %v3738_v5  ;;  %v1755_v41 = vsel %vm1754_vm12, %v3775_v24, %v1751_v59  ;;  %v2293_v43 = vmul.f32 -1.442695, %v3743_v36  ;;  %v602_v27 = vpop.f32.mrf.mxu1 }
 0x134   :  { %v407_v46 = vadd.f32 %v3336_v21, %v3653_v23  ;;  %v487_v13 = vadd.f32 %v3336_v21, %v3659_v1  ;;  %v2526_v18 = vpop.eup %2525  ;;  %v1760_v5 = vsel %vm3786_vm4, %v1759_v49, %v1755_v41  ;;  %v1290_v45 = vsel %vm1289_vm14, %v2522_v56, %v1286_v2  ;;  %vm1769_vm2 = vmor %vm1767_vm7, %vm1768_vm13 }
 0x135   :  { %v1765_v42 = vmul.f32 %v2524_v57, %v1764_v40  ;;  %2527 = vpow2.f32 %v2324_v28  ;;  %2036 = vst.msk [vmem:[%s4536_s6 + $0x180] sm:$0xff] %vm1987_vm1, %v1760_v5  ;;  %v1295_v61 = vsel %vm3800_vm5, %v1294_v63, %v1290_v45  ;;  %v1298_v23 = vmul.f32 %v2526_v18, %v3782_v16 }
 0x136   :  { %vm1303_vm15 = vweird.f32 %v2526_v18  ;;  %2529 = vpow2.f32 %v2293_v43  ;;  %2005 = vst.msk [vmem:[%s4536_s6 + $0x88] sm:$0xff] %vm1987_vm1, %v1295_v61  ;;  %v675_v36 = vadd.f32 %v3329_v19, %v3711_v0  ;;  %v598_v47 = vadd.f32 %v3329_v19, %v3719_v50  ;;  %v3955_v61 = vld [vmem:[%s4534_s4] ss:$0 sm:$0xff] }
 0x137   :  { %v1766_v1 = vadd.f32 %v2524_v57, %v1765_v42  ;;  %v409_v24 = vadd.f32 %v3336_v21, %v3698_v44  ;;  %v1299_v48 = vsub.f32 1.0, %v1298_v23  ;;  %723 = vst [vmem:[#allocation2 + $0x80] sm:$0xff] %v407_v46  ;;  %v489_v49 = vadd.f32 %v3336_v21, %v3706_v9  ;;  %vm1304_vm3 = vmor %vm1302_vm11, %vm1303_vm15 }
 0x138   :  { %v678_v56 = vadd.f32 %v3329_v19, %v3759_v26  ;;  %v600_v0 = vadd.f32 %v3329_v19, %v3773_v54  ;;  %755 = vst [vmem:[#allocation2 + $0x180] sm:$0xff] %v487_v13  ;;  %v2325_v39 = vmul.f32 -1.442695, %v675_v36  ;;  %v2294_v44 = vmul.f32 -1.442695, %v598_v47 }
 0x139   :  { %v682_v7 = vpop.f32.mrf.mxu3  ;;  %v1770_v50 = vsel %vm1769_vm2, %v2524_v57, %v1766_v1  ;;  %v412_v38 = vadd.f32 %v3336_v21, %v3749_v52  ;;  %v1300_v62 = vmul.f32 %v2526_v18, %v1299_v48  ;;  %724 = vst [vmem:[#allocation2 + $0x88] sm:$0xff] %v409_v24  ;;  %v492_v26 = vadd.f32 %v3336_v21, %v3769_v14  ;;  %v3905_v63 = vpop.f32.mrf.mxu2 }
 0x13a   :  { %v1775_v32 = vsel %vm3820_vm8, %v1774_v6, %v1770_v50  ;;  %v2326_v9 = vmul.f32 -1.442695, %v678_v56  ;;  %v2295_v33 = vmul.f32 -1.442695, %v600_v0  ;;  %2531 = vpow2.f32 %v2325_v39  ;;  %756 = vst [vmem:[#allocation2 + $0x188] sm:$0xff] %v489_v49 }
 0x13b   :  { %v2528_v60 = vpop.eup %2527  ;;  %2037 = vst.msk [vmem:[%s4536_s6 + $0x188] sm:$0xff] %vm1987_vm1, %v1775_v32  ;;  %v680_v54 = vadd.f32 %v3329_v19, %v679_v34  ;;  %v603_v52 = vadd.f32 %v3329_v19, %v602_v27  ;;  %v1301_v4 = vadd.f32 %v2526_v18, %v1300_v62  ;;  %2533 = vpow2.f32 %v2294_v44  ;;  %v604_v57 = vpop.f32.mrf.mxu1 }
 0x13c   :  { %v2530_v53 = vpop.eup %2529  ;;  %v3896_v55 = vadd.f32 1.0, %v2528_v60  ;;  %v414_v10 = vadd.f32 %v3336_v21, %v3824_v35  ;;  %v1309_v37 = vor.u32 1.1754944e-38, %v1308_v12  ;;  %2535 = vpow2.f32 %v2326_v9  ;;  %725 = vst [vmem:[#allocation2 + $0x90] sm:$0xff] %v412_v38 }
 0x13d   :  { %v3903_v14 = vadd.f32 1.0, %v2530_v53  ;;  %v1305_v31 = vsel %vm1304_vm3, %v2526_v18, %v1301_v4  ;;  %vm1307_vm4 = vcmp.eq.f32.partialorder %v1306_v8, 8.507059e+37  ;;  %757 = vst [vmem:[#allocation2 + $0x190] sm:$0xff] %v492_v26  ;;  %v2327_v58 = vmul.f32 -1.442695, %v680_v54 }
 0x13e   :  { %2537 = vrcp.f32 %v3896_v55  ;;  %v1310_v51 = vsel %vm1307_vm4, %v1309_v37, %v1305_v31  ;;  %726 = vst [vmem:[#allocation2 + $0x98] sm:$0xff] %v414_v10  ;;  %v2296_v29 = vmul.f32 -1.442695, %v603_v52  ;;  %v1786_v34 = vand.u32 2147483647, %v3896_v55 }
 0x13f   :  { %2539 = vrcp.f32 %v3903_v14  ;;  %2006 = vst.msk [vmem:[%s4536_s6 + $0x90] sm:$0xff] %vm1987_vm1, %v1310_v51  ;;  %v1788_v15 = vand.u32 2147483648, %v3896_v55  ;;  %v1323_v17 = vand.u32 2147483648, %v3903_v14  ;;  %v494_v20 = vadd.f32 %v3336_v21, %v3845_v25 }
 0x140   :  { %2541 = vpow2.f32 %v2295_v33  ;;  %v2532_v16 = vpop.eup %2531  ;;  %v1321_v30 = vand.u32 2147483647, %v3903_v14  ;;  %v683_v11 = vadd.f32 %v3329_v19, %v682_v7  ;;  %v417_v12 = vadd.f32 %v3336_v21, %v416_v3  ;;  %v3940_v21 = vpop.f32.mrf.mxu0 }
 0x141   :  { %v3915_v6 = vpop.f32.mrf.mxu3  ;;  %v2534_v22 = vpop.eup %2533  ;;  %v3923_v35 = vadd.f32 1.0, %v2532_v16  ;;  %2543 = vpow2.f32 %v2327_v58  ;;  %758 = vst [vmem:[#allocation2 + $0x198] sm:$0xff] %v494_v20  ;;  %vm1782_vm5 = vweird.f32 %v3896_v55  ;;  %vm1317_vm6 = vweird.f32 %v3903_v14 }
 0x142   :  { %v2536_v59 = vpop.eup %2535  ;;  %v3926_v8 = vadd.f32 1.0, %v2534_v22  ;;  %vm3935_vm9 = vcmp.eq.f32.partialorder %v1786_v34, 8.507059e+37  ;;  %v1789_v19 = vor.u32 1.1754944e-38, %v1788_v15  ;;  %v1324_v41 = vor.u32 1.1754944e-38, %v1323_v17  ;;  %727 = vst [vmem:[#allocation2 + $0xa0] sm:$0xff] %v417_v12  ;;  %v3960_v1 = vpop.f32.mrf.mxu2 }
 0x143   :  { %2545 = vrcp.f32 %v3923_v35  ;;  %vm3944_vm7 = vcmp.eq.f32.partialorder %v1321_v30, 8.507059e+37  ;;  %v1803_v27 = vand.u32 2147483648, %v3923_v35  ;;  %v2328_v18 = vmul.f32 -1.442695, %v683_v11  ;;  %v3966_v56 = vpop.f32.mrf.mxu1 }
 0x144   :  { %v2538_v2 = vpop.eup %2537  ;;  %2547 = vrcp.f32 %v3926_v8  ;;  %v1801_v45 = vand.u32 2147483647, %v3923_v35  ;;  %v3950_v42 = vadd.f32 1.0, %v2536_v59  ;;  %v3958_v23 = vadd.f32 %v3955_v61, %v604_v57 }
 0x145   :  { %v3932_v40 = vpop.eup %2539  ;;  %v1778_v28 = vmul.f32 %v2538_v2, %v3896_v55  ;;  %2549 = vpow2.f32 %v2296_v29  ;;  %v1336_v24 = vand.u32 2147483647, %v3926_v8  ;;  %v1338_v48 = vand.u32 2147483648, %v3926_v8 }
 0x146   :  { %v2542_v43 = vpop.eup %2541  ;;  %v1313_v46 = vmul.f32 %v3932_v40, %v3903_v14  ;;  %vm1783_vm10 = vweird.f32 %v2538_v2  ;;  %vm1797_vm0 = vweird.f32 %v3923_v35  ;;  %vm1332_vm8 = vweird.f32 %v3926_v8 }
 0x147   :  { %v1779_v5 = vsub.f32 1.0, %v1778_v28  ;;  %v2544_v36 = vpop.eup %2543  ;;  %v3964_v49 = vadd.f32 1.0, %v2542_v43  ;;  %2551 = vrcp.f32 %v3950_v42  ;;  %vm1318_vm11 = vweird.f32 %v3932_v40  ;;  %vm1784_vm13 = vmor %vm1782_vm5, %vm1783_vm10 }
 0x148   :  { %v1314_v47 = vsub.f32 1.0, %v1313_v46  ;;  %v1804_v39 = vor.u32 1.1754944e-38, %v1803_v27  ;;  %2553 = vpow2.f32 %v2328_v18  ;;  %vm3976_vm12 = vcmp.eq.f32.partialorder %v1801_v45, 8.507059e+37  ;;  %vm1319_vm15 = vmor %vm1317_vm6, %vm1318_vm11  ;;  %v4010_v34 = vpop.f32.mrf.mxu0 }
 0x149   :  { %v1780_v0 = vmul.f32 %v2538_v2, %v1779_v5  ;;  %v2546_v7 = vpop.eup %2545  ;;  %v3973_v44 = vpop.f32.mrf.mxu3  ;;  %2555 = vrcp.f32 %v3964_v49  ;;  %v3981_v33 = vadd.f32 1.0, %v2544_v36  ;;  %vm3988_vm14 = vcmp.eq.f32.partialorder %v1336_v24, 8.507059e+37 }
 0x14a   :  { %v1315_v50 = vmul.f32 %v3932_v40, %v1314_v47  ;;  %v2548_v38 = vpop.eup %2547  ;;  %v1793_v62 = vmul.f32 %v2546_v7, %v3923_v35  ;;  %v1339_v3 = vor.u32 1.1754944e-38, %v1338_v48  ;;  %v1816_v53 = vand.u32 2147483647, %v3950_v42  ;;  %v4023_v12 = vpop.f32.mrf.mxu2 }
 0x14b   :  { %v1781_v32 = vadd.f32 %v2538_v2, %v1780_v0  ;;  %v2550_v60 = vpop.eup %2549  ;;  %v1328_v54 = vmul.f32 %v2548_v38, %v3926_v8  ;;  %vm1798_vm2 = vweird.f32 %v2546_v7  ;;  %v1818_v55 = vand.u32 2147483648, %v3950_v42  ;;  %v4029_v25 = vpop.f32.mrf.mxu1 }
 0x14c   :  { %v1316_v26 = vadd.f32 %v3932_v40, %v1315_v50  ;;  %v1794_v10 = vsub.f32 1.0, %v1793_v62  ;;  %v1351_v57 = vand.u32 2147483647, %v3964_v49  ;;  %v1353_v16 = vand.u32 2147483648, %v3964_v49 }
 0x14d   :  { %v1785_v4 = vsel %vm1784_vm13, %v2538_v2, %v1781_v32  ;;  %v1329_v58 = vsub.f32 1.0, %v1328_v54  ;;  %v2552_v51 = vpop.eup %2551  ;;  %2557 = vrcp.f32 %v3981_v33  ;;  %vm1333_vm3 = vweird.f32 %v2548_v38 }
 0x14e   :  { %v1790_v37 = vsel %vm3935_vm9, %v1789_v19, %v1785_v4  ;;  %v1320_v31 = vsel %vm1319_vm15, %v3932_v40, %v1316_v26  ;;  %v1795_v29 = vmul.f32 %v2546_v7, %v1794_v10  ;;  %v2554_v15 = vpop.eup %2553  ;;  %v1808_v20 = vmul.f32 %v2552_v51, %v3950_v42  ;;  %vm1799_vm9 = vmor %vm1797_vm0, %vm1798_vm2 }
 0x14f   :  { %2038 = vst.msk [vmem:[%s4536_s6 + $0x190] sm:$0xff] %vm1987_vm1, %v1790_v37  ;;  %v1325_v14 = vsel %vm3944_vm7, %v1324_v41, %v1320_v31  ;;  %v1330_v17 = vmul.f32 %v2548_v38, %v1329_v58  ;;  %vm1812_vm4 = vweird.f32 %v3950_v42  ;;  %v2556_v22 = vpop.eup %2555  ;;  %vm4018_vm5 = vcmp.eq.f32.partialorder %v1816_v53, 8.507059e+37  ;;  %vm1334_vm10 = vmor %vm1332_vm8, %vm1333_vm3 }
 0x150   :  { %2007 = vst.msk [vmem:[%s4536_s6 + $0x98] sm:$0xff] %vm1987_vm1, %v1325_v14  ;;  %v1796_v30 = vadd.f32 %v2546_v7, %v1795_v29  ;;  %v1819_v59 = vor.u32 1.1754944e-38, %v1818_v55  ;;  %vm1347_vm6 = vweird.f32 %v3964_v49  ;;  %v1809_v40 = vsub.f32 1.0, %v1808_v20  ;;  %v423_v54 = vpop.f32.mrf.mxu0 }
 0x151   :  { %v1331_v2 = vadd.f32 %v2548_v38, %v1330_v17  ;;  %vm1813_vm7 = vweird.f32 %v2552_v51  ;;  %v1343_v28 = vmul.f32 %v2556_v22, %v3964_v49  ;;  %vm4034_vm11 = vcmp.eq.f32.partialorder %v1351_v57, 8.507059e+37  ;;  %v4042_v5 = vpop.f32.mrf.mxu3 }
 0x152   :  { %v1800_v19 = vsel %vm1799_vm9, %v2546_v7, %v1796_v30  ;;  %v1354_v43 = vor.u32 1.1754944e-38, %v1353_v16  ;;  %v4038_v46 = vadd.f32 1.0, %v2550_v60  ;;  %v1810_v27 = vmul.f32 %v2552_v51, %v1809_v40  ;;  %vm1814_vm8 = vmor %vm1812_vm4, %vm1813_vm7  ;;  %v4069_v60 = vld [vmem:[%s4532_s2] ss:$0 sm:$0xff]  ;;  %v503_v10 = vpop.f32.mrf.mxu2 }
 0x153   :  { %v1805_v35 = vsel %vm3976_vm12, %v1804_v39, %v1800_v19  ;;  %v1335_v13 = vsel %vm1334_vm10, %v2548_v38, %v1331_v2  ;;  %v1344_v18 = vsub.f32 1.0, %v1343_v28  ;;  %v2558_v45 = vpop.eup %2557  ;;  %vm1348_vm0 = vweird.f32 %v2556_v22 }
 0x154   :  { %2039 = vst.msk [vmem:[%s4536_s6 + $0x198] sm:$0xff] %vm1987_vm1, %v1805_v35  ;;  %v1340_v8 = vsel %vm3988_vm14, %v1339_v3, %v1335_v13  ;;  %v1831_v36 = vand.u32 2147483647, %v3981_v33  ;;  %2559 = vrcp.f32 %v4038_v46  ;;  %v1811_v47 = vadd.f32 %v2552_v51, %v1810_v27  ;;  %vm1349_vm12 = vmor %vm1347_vm6, %vm1348_vm0 }
 0x155   :  { %2008 = vst.msk [vmem:[%s4536_s6 + $0xa0] sm:$0xff] %vm1987_vm1, %v1340_v8  ;;  %v1345_v24 = vmul.f32 %v2556_v22, %v1344_v18  ;;  %v1823_v48 = vmul.f32 %v2558_v45, %v3981_v33  ;;  %v1833_v0 = vand.u32 2147483648, %v3981_v33  ;;  %v1366_v7 = vand.u32 2147483647, %v4038_v46 }
 0x156   :  { %v1368_v50 = vand.u32 2147483648, %v4038_v46  ;;  %v4063_v39 = vadd.f32 1.0, %v2554_v15  ;;  %v2297_v38 = vmul.f32 -1.442695, %v3958_v23  ;;  %v1815_v32 = vsel %vm1814_vm8, %v2552_v51, %v1811_v47  ;;  %v612_v51 = vpop.f32.mrf.mxu1 }
 0x157   :  { %v1346_v62 = vadd.f32 %v2556_v22, %v1345_v24  ;;  %v1824_v9 = vsub.f32 1.0, %v1823_v48  ;;  %v497_v42 = vadd.f32 %v4069_v60, %v3905_v63  ;;  %v1820_v26 = vsel %vm4018_vm5, %v1819_v59, %v1815_v32 }
 0x158   :  { %vm1827_vm13 = vweird.f32 %v3981_v33  ;;  %vm4079_vm14 = vcmp.eq.f32.partialorder %v1831_v36, 8.507059e+37  ;;  %2561 = vrcp.f32 %v4063_v39  ;;  %2040 = vst.msk [vmem:[%s4536_s6 + $0x1a0] sm:$0xff] %vm1987_vm1, %v1820_v26  ;;  %vm1828_vm15 = vweird.f32 %v2558_v45  ;;  %v4136_v27 = vpop.f32.mrf.mxu0 }
 0x159   :  { %v1350_v63 = vsel %vm1349_vm12, %v2556_v22, %v1346_v62  ;;  %v1825_v52 = vmul.f32 %v2558_v45, %v1824_v9  ;;  %v1834_v3 = vor.u32 1.1754944e-38, %v1833_v0  ;;  %vm1362_vm2 = vweird.f32 %v4038_v46  ;;  %759 = vst [vmem:[#allocation2 + $0x1a0] sm:$0xff] %v497_v42  ;;  %vm1829_vm4 = vmor %vm1827_vm13, %vm1828_vm15  ;;  %v692_v30 = vpop.f32.mrf.mxu3 }
 0x15a   :  { %v2560_v49 = vpop.eup %2559  ;;  %v1355_v53 = vsel %vm4034_vm11, %v1354_v43, %v1350_v63  ;;  %2563 = vpow2.f32 %v2297_v38  ;;  %v685_v4 = vadd.f32 %v3955_v61, %v3915_v6  ;;  %vm4098_vm3 = vcmp.eq.f32.partialorder %v1366_v7, 8.507059e+37 }
 0x15b   :  { %2009 = vst.msk [vmem:[%s4536_s6 + $0xa8] sm:$0xff] %vm1987_vm1, %v1355_v53  ;;  %v1826_v55 = vadd.f32 %v2558_v45, %v1825_v52  ;;  %v1358_v37 = vmul.f32 %v2560_v49, %v4038_v46  ;;  %v1369_v58 = vor.u32 1.1754944e-38, %v1368_v50  ;;  %v1846_v57 = vand.u32 2147483647, %v4063_v39 }
 0x15c   :  { %v1848_v6 = vand.u32 2147483648, %v4063_v39  ;;  %v2329_v14 = vmul.f32 -1.442695, %v685_v4  ;;  %v608_v29 = vadd.f32 %v3955_v61, %v3966_v56  ;;  %v419_v16 = vadd.f32 %v4069_v60, %v3940_v21 }
 0x15d   :  { %v1830_v15 = vsel %vm1829_vm4, %v2558_v45, %v1826_v55  ;;  %v1359_v17 = vsub.f32 1.0, %v1358_v37  ;;  %v499_v20 = vadd.f32 %v4069_v60, %v3960_v1  ;;  %v688_v22 = vadd.f32 %v3955_v61, %v3973_v44 }
 0x15e   :  { %v2562_v33 = vpop.eup %2561  ;;  %v1835_v11 = vsel %vm4079_vm14, %v1834_v3, %v1830_v15  ;;  %2565 = vpow2.f32 %v2329_v14  ;;  %v2298_v59 = vmul.f32 -1.442695, %v608_v29  ;;  %728 = vst [vmem:[#allocation2 + $0xa8] sm:$0xff] %v419_v16  ;;  %v610_v56 = vadd.f32 %v3955_v61, %v4029_v25  ;;  %v4151_v0 = vpop.f32.mrf.mxu1 }
 0x15f   :  { %2041 = vst.msk [vmem:[%s4536_s6 + $0x1a8] sm:$0xff] %vm1987_vm1, %v1835_v11  ;;  %v1360_v21 = vmul.f32 %v2560_v49, %v1359_v17  ;;  %vm1363_vm5 = vweird.f32 %v2560_v49  ;;  %v1838_v1 = vmul.f32 %v2562_v33, %v4063_v39  ;;  %v2330_v44 = vmul.f32 -1.442695, %v688_v22 }
 0x160   :  { %v2564_v2 = vpop.eup %2563  ;;  %2567 = vpow2.f32 %v2298_v59  ;;  %760 = vst [vmem:[#allocation2 + $0x1a8] sm:$0xff] %v499_v20  ;;  %v2299_v40 = vmul.f32 -1.442695, %v610_v56  ;;  %v422_v28 = vadd.f32 %v4069_v60, %v4010_v34  ;;  %v502_v25 = vadd.f32 %v4069_v60, %v4023_v12  ;;  %vm1364_vm6 = vmor %vm1362_vm2, %vm1363_vm5 }
 0x161   :  { %v1361_v19 = vadd.f32 %v2560_v49, %v1360_v21  ;;  %v1839_v41 = vsub.f32 1.0, %v1838_v1  ;;  %v4128_v43 = vadd.f32 1.0, %v2564_v2  ;;  %2569 = vpow2.f32 %v2330_v44  ;;  %v4157_v9 = vpop.f32.mrf.mxu3 }
 0x162   :  { %2571 = vpow2.f32 %v2299_v40  ;;  %729 = vst [vmem:[#allocation2 + $0xb0] sm:$0xff] %v422_v28  ;;  %v690_v35 = vadd.f32 %v3955_v61, %v4042_v5  ;;  %v613_v13 = vadd.f32 %v3955_v61, %v612_v51  ;;  %v424_v34 = vadd.f32 %v4069_v60, %v423_v54  ;;  %v4142_v5 = vpop.f32.mrf.mxu2  ;;  %v4181_v51 = vpop.f32.mrf.mxu0 }
 0x163   :  { %v1365_v12 = vsel %vm1364_vm6, %v2560_v49, %v1361_v19  ;;  %v1840_v18 = vmul.f32 %v2562_v33, %v1839_v41  ;;  %vm1843_vm9 = vweird.f32 %v2562_v33  ;;  %2573 = vrcp.f32 %v4128_v43  ;;  %761 = vst [vmem:[#allocation2 + $0x1b0] sm:$0xff] %v502_v25 }
 0x164   :  { %v2566_v45 = vpop.eup %2565  ;;  %v1370_v46 = vsel %vm4098_vm3, %v1369_v58, %v1365_v12  ;;  %vm1842_vm7 = vweird.f32 %v4063_v39  ;;  %v2331_v8 = vmul.f32 -1.442695, %v690_v35  ;;  %730 = vst [vmem:[#allocation2 + $0xb8] sm:$0xff] %v424_v34  ;;  %v2300_v24 = vmul.f32 -1.442695, %v613_v13 }
 0x165   :  { %2010 = vst.msk [vmem:[%s4536_s6 + $0xb0] sm:$0xff] %vm1987_vm1, %v1370_v46  ;;  %v1841_v36 = vadd.f32 %v2562_v33, %v1840_v18  ;;  %v4148_v47 = vadd.f32 1.0, %v2566_v45  ;;  %v504_v48 = vadd.f32 %v4069_v60, %v503_v10  ;;  %vm1844_vm10 = vmor %vm1842_vm7, %vm1843_vm9  ;;  %vm1847_vm11 = vcmp.eq.f32.partialorder %v1846_v57, 8.507059e+37 }
 0x166   :  { %v2568_v7 = vpop.eup %2567  ;;  %v1849_v50 = vor.u32 1.1754944e-38, %v1848_v6  ;;  %2575 = vpow2.f32 %v2331_v8  ;;  %v1381_v32 = vand.u32 2147483647, %v4128_v43  ;;  %v1383_v62 = vand.u32 2147483648, %v4128_v43  ;;  %v4200_v56 = vpop.f32.mrf.mxu1 }
 0x167   :  { %v2570_v39 = vpop.eup %2569  ;;  %v1845_v38 = vsel %vm1844_vm10, %v2562_v33, %v1841_v36  ;;  %2577 = vrcp.f32 %v4148_v47  ;;  %762 = vst [vmem:[#allocation2 + $0x1b8] sm:$0xff] %v504_v48  ;;  %v4159_v23 = vadd.f32 1.0, %v2568_v7  ;;  %v693_v63 = vadd.f32 %v3955_v61, %v692_v30 }
 0x168   :  { %v2572_v42 = vpop.eup %2571  ;;  %v1850_v26 = vsel %vm1847_vm11, %v1849_v50, %v1845_v38  ;;  %v4161_v54 = vadd.f32 1.0, %v2570_v39  ;;  %2579 = vpow2.f32 %v2300_v24  ;;  %v1861_v53 = vand.u32 2147483647, %v4148_v47 }
 0x169   :  { %v2574_v52 = vpop.eup %2573  ;;  %2042 = vst.msk [vmem:[%s4536_s6 + $0x1b0] sm:$0xff] %vm1987_vm1, %v1850_v26  ;;  %v4168_v3 = vadd.f32 1.0, %v2572_v42  ;;  %v1863_v4 = vand.u32 2147483648, %v4148_v47  ;;  %2581 = vrcp.f32 %v4159_v23  ;;  %vm1377_vm0 = vweird.f32 %v4128_v43  ;;  %v4215_v35 = vpop.f32.mrf.mxu3 }
 0x16a   :  { %v1373_v49 = vmul.f32 %v2574_v52, %v4128_v43  ;;  %v1398_v10 = vand.u32 2147483648, %v4159_v23  ;;  %2583 = vrcp.f32 %v4161_v54  ;;  %vm4177_vm8 = vcmp.eq.f32.partialorder %v1381_v32, 8.507059e+37  ;;  %v4192_v22 = vpop.f32.mrf.mxu2  ;;  %v4239_v26 = vpop.f32.mrf.mxu0 }
 0x16b   :  { %v1384_v58 = vor.u32 1.1754944e-38, %v1383_v62  ;;  %v2332_v57 = vmul.f32 -1.442695, %v693_v63  ;;  %vm1378_vm12 = vweird.f32 %v2574_v52  ;;  %vm1857_vm13 = vweird.f32 %v4148_v47 }
 0x16c   :  { %v2576_v55 = vpop.eup %2575  ;;  %v1374_v37 = vsub.f32 1.0, %v1373_v49  ;;  %v1396_v14 = vand.u32 2147483647, %v4159_v23  ;;  %2585 = vrcp.f32 %v4168_v3  ;;  %vm4187_vm14 = vcmp.eq.f32.partialorder %v1861_v53, 8.507059e+37  ;;  %vm1379_vm4 = vmor %vm1377_vm0, %vm1378_vm12 }
 0x16d   :  { %v2578_v6 = vpop.eup %2577  ;;  %v1864_v17 = vor.u32 1.1754944e-38, %v1863_v4  ;;  %v1876_v20 = vand.u32 2147483647, %v4161_v54  ;;  %vm1392_vm15 = vweird.f32 %v4159_v23  ;;  %v4195_v33 = vor.u32 1.1754944e-38, %v1398_v10 }
 0x16e   :  { %v1375_v29 = vmul.f32 %v2574_v52, %v1374_v37  ;;  %v1853_v16 = vmul.f32 %v2578_v6, %v4148_v47  ;;  %v2580_v30 = vpop.eup %2579  ;;  %v1878_v11 = vand.u32 2147483648, %v4161_v54  ;;  %v4198_v59 = vadd.f32 1.0, %v2576_v55 }
 0x16f   :  { %v2582_v21 = vpop.eup %2581  ;;  %vm1858_vm2 = vweird.f32 %v2578_v6  ;;  %vm1872_vm3 = vweird.f32 %v4161_v54  ;;  %2587 = vpow2.f32 %v2332_v57  ;;  %vm4207_vm5 = vcmp.eq.f32.partialorder %v1396_v14, 8.507059e+37 }
 0x170   :  { %v1376_v1 = vadd.f32 %v2574_v52, %v1375_v29  ;;  %v1854_v44 = vsub.f32 1.0, %v1853_v16  ;;  %v2584_v2 = vpop.eup %2583  ;;  %v1388_v40 = vmul.f32 %v2582_v21, %v4159_v23  ;;  %v1411_v25 = vand.u32 2147483647, %v4168_v3  ;;  %vm1859_vm10 = vmor %vm1857_vm13, %vm1858_vm2 }
 0x171   :  { %v1413_v19 = vand.u32 2147483648, %v4168_v3  ;;  %v4213_v41 = vadd.f32 1.0, %v2580_v30  ;;  %v1868_v12 = vmul.f32 %v2584_v2, %v4161_v54  ;;  %vm4218_vm6 = vcmp.eq.f32.partialorder %v1876_v20, 8.507059e+37  ;;  %v699_v54 = vpop.f32.mrf.mxu3 }
 0x172   :  { %v1380_v13 = vsel %vm1379_vm4, %v2574_v52, %v1376_v1  ;;  %v1855_v34 = vmul.f32 %v2578_v6, %v1854_v44  ;;  %vm1407_vm9 = vweird.f32 %v4168_v3  ;;  %v2586_v18 = vpop.eup %2585  ;;  %v1389_v46 = vsub.f32 1.0, %v1388_v40  ;;  %v4253_v55 = vpop.f32.mrf.mxu2 }
 0x173   :  { %v1385_v45 = vsel %vm4177_vm8, %v1384_v58, %v1380_v13  ;;  %v1879_v8 = vor.u32 1.1754944e-38, %v1878_v11  ;;  %2589 = vrcp.f32 %v4198_v59  ;;  %vm1393_vm7 = vweird.f32 %v2582_v21  ;;  %v433_v43 = vpop.f32.mrf.mxu0 }
 0x174   :  { %2011 = vst.msk [vmem:[%s4536_s6 + $0xb8] sm:$0xff] %vm1987_vm1, %v1385_v45  ;;  %v1856_v36 = vadd.f32 %v2578_v6, %v1855_v34  ;;  %v1869_v24 = vsub.f32 1.0, %v1868_v12  ;;  %v1403_v48 = vmul.f32 %v2586_v18, %v4168_v3  ;;  %v1390_v7 = vmul.f32 %v2582_v21, %v1389_v46  ;;  %vm1394_vm12 = vmor %vm1392_vm15, %vm1393_vm7 }
 0x175   :  { %vm4234_vm11 = vcmp.eq.f32.partialorder %v1411_v25, 8.507059e+37  ;;  %v1414_v39 = vor.u32 1.1754944e-38, %v1413_v19  ;;  %2591 = vrcp.f32 %v4213_v41  ;;  %v2588_v38 = vpop.eup %2587  ;;  %vm1873_vm0 = vweird.f32 %v2584_v2 }
 0x176   :  { %v1860_v32 = vsel %vm1859_vm10, %v2578_v6, %v1856_v36  ;;  %v1870_v62 = vmul.f32 %v2584_v2, %v1869_v24  ;;  %v1404_v42 = vsub.f32 1.0, %v1403_v48  ;;  %v1391_v47 = vadd.f32 %v2582_v21, %v1390_v7  ;;  %vm1874_vm13 = vmor %vm1872_vm3, %vm1873_vm0  ;;  %v619_v6 = vpop.f32.mrf.mxu1 }
 0x177   :  { %v1865_v63 = vsel %vm4187_vm14, %v1864_v17, %v1860_v32  ;;  %vm1408_vm8 = vweird.f32 %v2586_v18  ;;  %v1891_v52 = vand.u32 2147483647, %v4198_v59  ;;  %v1893_v4 = vand.u32 2147483648, %v4198_v59 }
 0x178   :  { %2043 = vst.msk [vmem:[%s4536_s6 + $0x1b8] sm:$0xff] %vm1987_vm1, %v1865_v63  ;;  %v1871_v49 = vadd.f32 %v2584_v2, %v1870_v62  ;;  %v1405_v53 = vmul.f32 %v2586_v18, %v1404_v42  ;;  %v1426_v10 = vand.u32 2147483647, %v4213_v41  ;;  %v1395_v31 = vsel %vm1394_vm12, %v2582_v21, %v1391_v47  ;;  %vm1409_vm14 = vmor %vm1407_vm9, %vm1408_vm8 }
 0x179   :  { %v2590_v37 = vpop.eup %2589  ;;  %v4258_v58 = vadd.f32 1.0, %v2588_v38  ;;  %v615_v23 = vadd.f32 %v3955_v61, %v4151_v0  ;;  %v427_v57 = vadd.f32 %v4069_v60, %v4136_v27  ;;  %v1400_v14 = vsel %vm4207_vm5, %v4195_v33, %v1395_v31  ;;  %v702_v42 = vpop.f32.mrf.mxu3 }
 0x17a   :  { %v1875_v29 = vsel %vm1874_vm13, %v2584_v2, %v1871_v49  ;;  %v1406_v16 = vadd.f32 %v2586_v18, %v1405_v53  ;;  %v1883_v15 = vmul.f32 %v2590_v37, %v4198_v59  ;;  %2012 = vst.msk [vmem:[%s4536_s6 + $0xc0] sm:$0xff] %vm1987_vm1, %v1400_v14  ;;  %vm1887_vm15 = vweird.f32 %v4198_v59  ;;  %v513_v24 = vpop.f32.mrf.mxu2 }
 0x17b   :  { %v2592_v17 = vpop.eup %2591  ;;  %v1880_v0 = vsel %vm4218_vm6, %v1879_v8, %v1875_v29  ;;  %vm1422_vm2 = vweird.f32 %v4213_v41  ;;  %v1428_v27 = vand.u32 2147483648, %v4213_v41  ;;  %vm4284_vm3 = vcmp.eq.f32.partialorder %v1891_v52, 8.507059e+37  ;;  %731 = vst [vmem:[#allocation2 + $0xc0] sm:$0xff] %v427_v57  ;;  %v4349_v29 = vpop.f32.mrf.mxu0 }
 0x17c   :  { %2044 = vst.msk [vmem:[%s4536_s6 + $0x1c0] sm:$0xff] %vm1987_vm1, %v1880_v0  ;;  %v1410_v20 = vsel %vm1409_vm14, %v2586_v18, %v1406_v16  ;;  %v1884_v30 = vsub.f32 1.0, %v1883_v15  ;;  %v1418_v3 = vmul.f32 %v2592_v17, %v4213_v41  ;;  %vm1888_vm4 = vweird.f32 %v2590_v37 }
 0x17d   :  { %v1415_v11 = vsel %vm4234_vm11, %v1414_v39, %v1410_v20  ;;  %v1894_v21 = vor.u32 1.1754944e-38, %v1893_v4  ;;  %2593 = vrcp.f32 %v4258_v58  ;;  %vm4296_vm5 = vcmp.eq.f32.partialorder %v1426_v10, 8.507059e+37  ;;  %vm1889_vm9 = vmor %vm1887_vm15, %vm1888_vm4 }
 0x17e   :  { %2013 = vst.msk [vmem:[%s4536_s6 + $0xc8] sm:$0xff] %vm1987_vm1, %v1415_v11  ;;  %v1885_v1 = vmul.f32 %v2590_v37, %v1884_v30  ;;  %v1419_v44 = vsub.f32 1.0, %v1418_v3  ;;  %v2301_v40 = vmul.f32 -1.442695, %v615_v23  ;;  %v1429_v28 = vor.u32 1.1754944e-38, %v1428_v27  ;;  %v622_v7 = vpop.f32.mrf.mxu1 }
 0x17f   :  { %v507_v25 = vadd.f32 %v4069_v60, %v4142_v5  ;;  %v695_v19 = vadd.f32 %v3955_v61, %v4157_v9  ;;  %v618_v13 = vadd.f32 %v3955_v61, %v4200_v56  ;;  %vm1423_vm6 = vweird.f32 %v2592_v17 }
 0x180   :  { %v1886_v34 = vadd.f32 %v2590_v37, %v1885_v1  ;;  %v1420_v12 = vmul.f32 %v2592_v17, %v1419_v44  ;;  %2595 = vpow2.f32 %v2301_v40  ;;  %v429_v5 = vadd.f32 %v4069_v60, %v4181_v51  ;;  %vm1424_vm7 = vmor %vm1422_vm2, %vm1423_vm6 }
 0x181   :  { %763 = vst [vmem:[#allocation2 + $0x1c0] sm:$0xff] %v507_v25  ;;  %v2333_v18 = vmul.f32 -1.442695, %v695_v19  ;;  %v2302_v45 = vmul.f32 -1.442695, %v618_v13  ;;  %v509_v9 = vadd.f32 %v4069_v60, %v4192_v22  ;;  %v698_v8 = vadd.f32 %v3955_v61, %v4215_v35 }
 0x182   :  { %v1890_v46 = vsel %vm1889_vm9, %v2590_v37, %v1886_v34  ;;  %v1421_v56 = vadd.f32 %v2592_v17, %v1420_v12  ;;  %v620_v36 = vadd.f32 %v3955_v61, %v619_v6  ;;  %v1906_v51 = vand.u32 2147483647, %v4258_v58  ;;  %732 = vst [vmem:[#allocation2 + $0xc8] sm:$0xff] %v429_v5  ;;  %v4354_v27 = vpop.f32.mrf.mxu2 }
 0x183   :  { %v2594_v48 = vpop.eup %2593  ;;  %v1895_v59 = vsel %vm4284_vm3, %v1894_v21, %v1890_v46  ;;  %2597 = vpow2.f32 %v2333_v18  ;;  %v432_v22 = vadd.f32 %v4069_v60, %v4239_v26  ;;  %v512_v41 = vadd.f32 %v4069_v60, %v4253_v55  ;;  %764 = vst [vmem:[#allocation2 + $0x1c8] sm:$0xff] %v509_v9 }
 0x184   :  { %2045 = vst.msk [vmem:[%s4536_s6 + $0x1c8] sm:$0xff] %vm1987_vm1, %v1895_v59  ;;  %v1425_v35 = vsel %vm1424_vm7, %v2592_v17, %v1421_v56  ;;  %v1898_v50 = vmul.f32 %v2594_v48, %v4258_v58  ;;  %2599 = vpow2.f32 %v2302_v45  ;;  %v2334_v38 = vmul.f32 -1.442695, %v698_v8 }
 0x185   :  { %v1430_v39 = vsel %vm4296_vm5, %v1429_v28, %v1425_v35  ;;  %v2303_v32 = vmul.f32 -1.442695, %v620_v36  ;;  %v700_v62 = vadd.f32 %v3955_v61, %v699_v54  ;;  %v623_v47 = vadd.f32 %v3955_v61, %v622_v7  ;;  %733 = vst [vmem:[#allocation2 + $0xd0] sm:$0xff] %v432_v22 }
 0x186   :  { %v2596_v26 = vpop.eup %2595  ;;  %2014 = vst.msk [vmem:[%s4536_s6 + $0xd0] sm:$0xff] %vm1987_vm1, %v1430_v39  ;;  %v1899_v63 = vsub.f32 1.0, %v1898_v50  ;;  %v434_v52 = vadd.f32 %v4069_v60, %v433_v43  ;;  %v514_v49 = vadd.f32 %v4069_v60, %v513_v24  ;;  %v1908_v53 = vand.u32 2147483648, %v4258_v58  ;;  %v624_v30 = vpop.f32.mrf.mxu1 }
 0x187   :  { %v4342_v4 = vadd.f32 1.0, %v2596_v26  ;;  %2601 = vpow2.f32 %v2334_v38  ;;  %v2335_v10 = vmul.f32 -1.442695, %v700_v62  ;;  %vm1903_vm10 = vweird.f32 %v2594_v48  ;;  %765 = vst [vmem:[#allocation2 + $0x1d0] sm:$0xff] %v512_v41  ;;  %v4388_v24 = vpop.f32.mrf.mxu0 }
 0x188   :  { %v1900_v55 = vmul.f32 %v2594_v48, %v1899_v63  ;;  %2603 = vpow2.f32 %v2303_v32  ;;  %v703_v37 = vadd.f32 %v3955_v61, %v702_v42  ;;  %734 = vst [vmem:[#allocation2 + $0xd8] sm:$0xff] %v434_v52  ;;  %vm1902_vm11 = vweird.f32 %v4258_v58 }
 0x189   :  { %v2598_v31 = vpop.eup %2597  ;;  %2605 = vrcp.f32 %v4342_v4  ;;  %v2304_v14 = vmul.f32 -1.442695, %v623_v47  ;;  %766 = vst [vmem:[#allocation2 + $0x1d8] sm:$0xff] %v514_v49  ;;  %vm1904_vm0 = vmor %vm1902_vm11, %vm1903_vm10  ;;  %v1909_v16 = vor.u32 1.1754944e-38, %v1908_v53  ;;  %vm1907_vm8 = vcmp.eq.f32.partialorder %v1906_v51, 8.507059e+37 }
 0x18a   :  { %v2600_v23 = vpop.eup %2599  ;;  %v1901_v57 = vadd.f32 %v2594_v48, %v1900_v55  ;;  %v4347_v6 = vadd.f32 1.0, %v2598_v31  ;;  %2607 = vpow2.f32 %v2335_v10  ;;  %v2336_v0 = vmul.f32 -1.442695, %v703_v37  ;;  %v4398_v39 = vpop.f32.mrf.mxu2 }
 0x18b   :  { %v4351_v15 = vadd.f32 1.0, %v2600_v23  ;;  %v1441_v20 = vand.u32 2147483647, %v4342_v4  ;;  %v1443_v3 = vand.u32 2147483648, %v4342_v4  ;;  %vm1437_vm12 = vweird.f32 %v4342_v4 }
 0x18c   :  { %v1905_v17 = vsel %vm1904_vm0, %v2594_v48, %v1901_v57  ;;  %2609 = vrcp.f32 %v4347_v6  ;;  %v1921_v1 = vand.u32 2147483647, %v4347_v6  ;;  %v1923_v44 = vand.u32 2147483648, %v4347_v6 }
 0x18d   :  { %v2602_v54 = vpop.eup %2601  ;;  %v1910_v58 = vsel %vm1907_vm8, %v1909_v16, %v1905_v17  ;;  %2611 = vrcp.f32 %v4351_v15  ;;  %v625_v28 = vadd.f32 %v3955_v61, %v624_v30  ;;  %vm4372_vm13 = vcmp.eq.f32.partialorder %v1441_v20, 8.507059e+37 }
 0x18e   :  { %v2604_v33 = vpop.eup %2603  ;;  %2046 = vst.msk [vmem:[%s4536_s6 + $0x1d0] sm:$0xff] %vm1987_vm1, %v1910_v58  ;;  %v4363_v11 = vadd.f32 1.0, %v2602_v54  ;;  %2613 = vpow2.f32 %v2304_v14  ;;  %v1456_v13 = vand.u32 2147483647, %v4351_v15  ;;  %v1458_v34 = vand.u32 2147483648, %v4351_v15 }
 0x18f   :  { %v2606_v21 = vpop.eup %2605  ;;  %v4367_v2 = vadd.f32 1.0, %v2604_v33  ;;  %2615 = vpow2.f32 %v2336_v0  ;;  %v1444_v18 = vor.u32 1.1754944e-38, %v1443_v3  ;;  %vm1917_vm14 = vweird.f32 %v4347_v6 }
 0x190   :  { %v1433_v40 = vmul.f32 %v2606_v21, %v4342_v4  ;;  %v2608_v25 = vpop.eup %2607  ;;  %2617 = vrcp.f32 %v4363_v11  ;;  %vm4382_vm15 = vcmp.eq.f32.partialorder %v1921_v1, 8.507059e+37  ;;  %v1924_v9 = vor.u32 1.1754944e-38, %v1923_v44 }
 0x191   :  { %2619 = vrcp.f32 %v4367_v2  ;;  %vm1452_vm2 = vweird.f32 %v4351_v15  ;;  %vm1438_vm3 = vweird.f32 %v2606_v21  ;;  %v2305_v36 = vmul.f32 -1.442695, %v625_v28 }
 0x192   :  { %v2610_v12 = vpop.eup %2609  ;;  %v1434_v43 = vsub.f32 1.0, %v1433_v40  ;;  %vm4390_vm4 = vcmp.eq.f32.partialorder %v1456_v13, 8.507059e+37  ;;  %v1459_v51 = vor.u32 1.1754944e-38, %v1458_v34  ;;  %v4394_v22 = vadd.f32 1.0, %v2608_v25  ;;  %vm1439_vm9 = vmor %vm1437_vm12, %vm1438_vm3  ;;  %v521_v13 = vpop.f32.mrf.mxu2 }
 0x193   :  { %v2612_v45 = vpop.eup %2611  ;;  %v1913_v61 = vmul.f32 %v2610_v12, %v4347_v6  ;;  %vm1918_vm5 = vweird.f32 %v2610_v12  ;;  %vm1932_vm6 = vweird.f32 %v4363_v11  ;;  %v1936_v41 = vand.u32 2147483647, %v4363_v11 }
 0x194   :  { %v2614_v46 = vpop.eup %2613  ;;  %v1435_v56 = vmul.f32 %v2606_v21, %v1434_v43  ;;  %v1448_v8 = vmul.f32 %v2612_v45, %v4351_v15  ;;  %vm1453_vm7 = vweird.f32 %v2612_v45  ;;  %2621 = vrcp.f32 %v4394_v22  ;;  %vm1919_vm10 = vmor %vm1917_vm14, %vm1918_vm5 }
 0x195   :  { %v1914_v48 = vsub.f32 1.0, %v1913_v61  ;;  %v2616_v7 = vpop.eup %2615  ;;  %v4404_v62 = vadd.f32 1.0, %v2614_v46  ;;  %2623 = vpow2.f32 %v2305_v36  ;;  %v1938_v53 = vand.u32 2147483648, %v4363_v11  ;;  %vm1454_vm11 = vmor %vm1452_vm2, %vm1453_vm7  ;;  %v704_v61 = vpop.f32.mrf.mxu3 }
 0x196   :  { %v1436_v35 = vadd.f32 %v2606_v21, %v1435_v56  ;;  %v1449_v50 = vsub.f32 1.0, %v1448_v8  ;;  %v2618_v38 = vpop.eup %2617  ;;  %v1471_v37 = vand.u32 2147483647, %v4367_v2  ;;  %v1473_v31 = vand.u32 2147483648, %v4367_v2 }
 0x197   :  { %v1915_v32 = vmul.f32 %v2610_v12, %v1914_v48  ;;  %v2620_v42 = vpop.eup %2619  ;;  %v1928_v47 = vmul.f32 %v2618_v38, %v4363_v11  ;;  %2625 = vrcp.f32 %v4404_v62  ;;  %v4424_v14 = vadd.f32 1.0, %v2616_v7 }
 0x198   :  { %v1440_v26 = vsel %vm1439_vm9, %v2606_v21, %v1436_v35  ;;  %v1450_v63 = vmul.f32 %v2612_v45, %v1449_v50  ;;  %v1463_v4 = vmul.f32 %v2620_v42, %v4367_v2  ;;  %vm1933_vm0 = vweird.f32 %v2618_v38  ;;  %v441_v21 = vpop.f32.mrf.mxu0 }
 0x199   :  { %v1445_v52 = vsel %vm4372_vm13, %v1444_v18, %v1440_v26  ;;  %v1916_v49 = vadd.f32 %v2610_v12, %v1915_v32  ;;  %v1929_v55 = vsub.f32 1.0, %v1928_v47  ;;  %vm1467_vm8 = vweird.f32 %v4367_v2  ;;  %vm1934_vm14 = vmor %vm1932_vm6, %vm1933_vm0 }
 0x19a   :  { %2015 = vst.msk [vmem:[%s4536_s6 + $0xd8] sm:$0xff] %vm1987_vm1, %v1445_v52  ;;  %v1451_v10 = vadd.f32 %v2612_v45, %v1450_v63  ;;  %v1464_v57 = vsub.f32 1.0, %v1463_v4  ;;  %v2622_v0 = vpop.eup %2621  ;;  %vm1468_vm12 = vweird.f32 %v2620_v42  ;;  %vm4439_vm13 = vcmp.eq.f32.partialorder %v1936_v41, 8.507059e+37 }
 0x19b   :  { %v1920_v23 = vsel %vm1919_vm10, %v2610_v12, %v1916_v49  ;;  %v1930_v17 = vmul.f32 %v2618_v38, %v1929_v55  ;;  %v2624_v58 = vpop.eup %2623  ;;  %v1939_v33 = vor.u32 1.1754944e-38, %v1938_v53  ;;  %v1943_v3 = vmul.f32 %v2622_v0, %v4394_v22  ;;  %vm1469_vm2 = vmor %vm1467_vm8, %vm1468_vm12 }
 0x19c   :  { %v1925_v6 = vsel %vm4382_vm15, %v1924_v9, %v1920_v23  ;;  %v1455_v16 = vsel %vm1454_vm11, %v2612_v45, %v1451_v10  ;;  %v1465_v54 = vmul.f32 %v2620_v42, %v1464_v57  ;;  %vm1472_vm15 = vcmp.eq.f32.partialorder %v1471_v37, 8.507059e+37  ;;  %v523_v37 = vpop.f32.mrf.mxu2 }
 0x19d   :  { %2047 = vst.msk [vmem:[%s4536_s6 + $0x1d8] sm:$0xff] %vm1987_vm1, %v1925_v6  ;;  %v1460_v15 = vsel %vm4390_vm4, %v1459_v51, %v1455_v16  ;;  %v1931_v20 = vadd.f32 %v2618_v38, %v1930_v17  ;;  %v1474_v44 = vor.u32 1.1754944e-38, %v1473_v31  ;;  %2627 = vrcp.f32 %v4424_v14  ;;  %v2626_v34 = vpop.eup %2625  ;;  %v2639_v51 = vld [vmem:[%s4534_s4] ss:$0 sm:$0xff]  ;;  %s2666_s4 = smov [#allocation2]  }
 0x19e   :  { %2016 = vst.msk [vmem:[%s4536_s6 + $0xe0] sm:$0xff] %vm1987_vm1, %v1460_v15  ;;  %v1466_v1 = vadd.f32 %v2620_v42, %v1465_v54  ;;  %v1944_v28 = vsub.f32 1.0, %v1943_v3  ;;  %v1951_v25 = vand.u32 2147483647, %v4394_v22  ;;  %v1953_v19 = vand.u32 2147483648, %v4394_v22  ;;  %s4502_s9 = sshll.u32 %s2666_s4, 4  ;;  %s2057_s9 = int_to_ptr.vmem [resolvable:$true] %s4502_s9 }
 0x19f   :  { %v1935_v40 = vsel %vm1934_vm14, %v2618_v38, %v1931_v20  ;;  %vm1947_vm3 = vweird.f32 %v4394_v22  ;;  %v4454_v43 = vadd.f32 1.0, %v2624_v58  ;;  %vm1948_vm4 = vweird.f32 %v2622_v0 }
 0x1a0   :  { %v1940_v11 = vsel %vm4439_vm13, %v1939_v33, %v1935_v40  ;;  %v1470_v12 = vsel %vm1469_vm2, %v2620_v42, %v1466_v1  ;;  %v1945_v18 = vmul.f32 %v2622_v0, %v1944_v28  ;;  %v1478_v45 = vmul.f32 %v2626_v34, %v4404_v62  ;;  %vm1949_vm9 = vmor %vm1947_vm3, %vm1948_vm4  ;;  %v443_v47 = vpop.f32.mrf.mxu0 }
 0x1a1   :  { %2048 = vst.msk [vmem:[%s4536_s6 + $0x1e0] sm:$0xff] %vm1987_vm1, %v1940_v11  ;;  %v1475_v2 = vsel %vm1472_vm15, %v1474_v44, %v1470_v12  ;;  %vm1482_vm5 = vweird.f32 %v4404_v62  ;;  %v1486_v5 = vand.u32 2147483647, %v4404_v62  ;;  %v1488_v9 = vand.u32 2147483648, %v4404_v62 }
 0x1a2   :  { %2017 = vst.msk [vmem:[%s4536_s6 + $0xe8] sm:$0xff] %vm1987_vm1, %v1475_v2  ;;  %2629 = vrcp.f32 %v4454_v43  ;;  %v1946_v46 = vadd.f32 %v2622_v0, %v1945_v18  ;;  %vm1952_vm6 = vcmp.eq.f32.partialorder %v1951_v25, 8.507059e+37  ;;  %v1954_v56 = vor.u32 1.1754944e-38, %v1953_v19 }
 0x1a3   :  { %v1479_v8 = vsub.f32 1.0, %v1478_v45  ;;  %v2628_v36 = vpop.eup %2627  ;;  %vm1483_vm7 = vweird.f32 %v2626_v34  ;;  %v437_v48 = vadd.f32 %v4069_v60, %v4349_v29  ;;  %v517_v59 = vadd.f32 %v4069_v60, %v4354_v27 }
 0x1a4   :  { %v705_v7 = vadd.f32 %v2639_v51, %v704_v61  ;;  %v1950_v35 = vsel %vm1949_vm9, %v2622_v0, %v1946_v46  ;;  %v1958_v41 = vmul.f32 %v2628_v36, %v4424_v14  ;;  %v439_v22 = vadd.f32 %v4069_v60, %v4388_v24  ;;  %vm1484_vm11 = vmor %vm1482_vm5, %vm1483_vm7 }
 0x1a5   :  { %v1480_v50 = vmul.f32 %v2626_v34, %v1479_v8  ;;  %v1955_v38 = vsel %vm1952_vm6, %v1954_v56, %v1950_v35  ;;  %vm4481_vm10 = vcmp.eq.f32.partialorder %v1486_v5, 8.507059e+37  ;;  %v1489_v29 = vor.u32 1.1754944e-38, %v1488_v9  ;;  %735 = vst [vmem:[#allocation2 + $0xe0] sm:$0xff] %v437_v48 }
 0x1a6   :  { %v2337_v27 = vmul.f32 -1.442695, %v705_v7  ;;  %2049 = vst.msk [vmem:[%s4536_s6 + $0x1e8] sm:$0xff] %vm1987_vm1, %v1955_v38  ;;  %v1959_v26 = vsub.f32 1.0, %v1958_v41  ;;  %v1966_v63 = vand.u32 2147483647, %v4424_v14  ;;  %v519_v24 = vadd.f32 %v4069_v60, %v4398_v39 }
 0x1a7   :  { %v1481_v42 = vadd.f32 %v2626_v34, %v1480_v50  ;;  %vm1963_vm0 = vweird.f32 %v2628_v36  ;;  %v1968_v49 = vand.u32 2147483648, %v4424_v14  ;;  %767 = vst [vmem:[#allocation2 + $0x1e0] sm:$0xff] %v517_v59  ;;  %v442_v53 = vadd.f32 %v4069_v60, %v441_v21 }
 0x1a8   :  { %v2630_v52 = vpop.eup %2629  ;;  %2631 = vpow2.f32 %v2337_v27  ;;  %v1960_v10 = vmul.f32 %v2628_v36, %v1959_v26  ;;  %736 = vst [vmem:[#allocation2 + $0xe8] sm:$0xff] %v439_v22  ;;  %v522_v39 = vadd.f32 %v4069_v60, %v521_v13  ;;  %v444_v62 = vadd.f32 %v4069_v60, %v443_v47 }
 0x1a9   :  { %v1485_v4 = vsel %vm1484_vm11, %v2626_v34, %v1481_v42  ;;  %v1493_v55 = vmul.f32 %v2630_v52, %v4454_v43  ;;  %768 = vst [vmem:[#allocation2 + $0x1e8] sm:$0xff] %v519_v24  ;;  %vm1962_vm8 = vweird.f32 %v4424_v14  ;;  %vm1967_vm13 = vcmp.eq.f32.partialorder %v1966_v63, 8.507059e+37 }
 0x1aa   :  { %v1490_v31 = vsel %vm4481_vm10, %v1489_v29, %v1485_v4  ;;  %v1961_v23 = vadd.f32 %v2628_v36, %v1960_v10  ;;  %vm1964_vm12 = vmor %vm1962_vm8, %vm1963_vm0  ;;  %v1969_v6 = vor.u32 1.1754944e-38, %v1968_v49  ;;  %v1503_v16 = vand.u32 2147483648, %v4454_v43  ;;  %737 = vst [vmem:[#allocation2 + $0xf0] sm:$0xff] %v442_v53 }
 0x1ab   :  { %2018 = vst.msk [vmem:[%s4536_s6 + $0xf0] sm:$0xff] %vm1987_vm1, %v1490_v31  ;;  %v1494_v57 = vsub.f32 1.0, %v1493_v55  ;;  %v524_v17 = vadd.f32 %v4069_v60, %v523_v37  ;;  %vm1498_vm14 = vweird.f32 %v2630_v52  ;;  %v1501_v54 = vand.u32 2147483647, %v4454_v43 }
 0x1ac   :  { %v1965_v0 = vsel %vm1964_vm12, %v2628_v36, %v1961_v23  ;;  %769 = vst [vmem:[#allocation2 + $0x1f0] sm:$0xff] %v522_v39  ;;  %vm1497_vm15 = vweird.f32 %v4454_v43  ;;  %v1504_v30 = vor.u32 1.1754944e-38, %v1503_v16 }
 0x1ad   :  { %v1495_v15 = vmul.f32 %v2630_v52, %v1494_v57  ;;  %v1970_v14 = vsel %vm1967_vm13, %v1969_v6, %v1965_v0  ;;  %738 = vst [vmem:[#allocation2 + $0xf8] sm:$0xff] %v444_v62  ;;  %vm1499_vm2 = vmor %vm1497_vm15, %vm1498_vm14  ;;  %vm1502_vm3 = vcmp.eq.f32.partialorder %v1501_v54, 8.507059e+37 }
 0x1ae   :  { %v2632_v58 = vpop.eup %2631  ;;  %2050 = vst.msk [vmem:[%s4536_s6 + $0x1f0] sm:$0xff] %vm1987_vm1, %v1970_v14 }
 0x1af   :  { %v1496_v20 = vadd.f32 %v2630_v52, %v1495_v15  ;;  %v1026_v60 = vadd.f32 1.0, %v2632_v58  ;;  %770 = vst [vmem:[#allocation2 + $0x1f8] sm:$0xff] %v524_v17 }
 0x1b0   :  { %2064 = dma.vmem_to_hbm [thread:$0]  %s2057_s9, 8192, %s2059_s12, [#allocation3], %s2667_s16, %s2667_s16, %s2668_s17  }
 0x1b1   :  { %v1500_v33 = vsel %vm1499_vm2, %v2630_v52, %v1496_v20  ;;  %2633 = vrcp.f32 %v1026_v60  ;;  %v1983_v40 = vand.u32 2147483648, %v1026_v60  ;;  %v1981_v25 = vand.u32 2147483647, %v1026_v60 }
 0x1b2   :  { %v1505_v3 = vsel %vm1502_vm3, %v1504_v30, %v1500_v33  ;;  %vm1977_vm5 = vweird.f32 %v1026_v60 }
 0x1b3   :  { %2019 = vst.msk [vmem:[%s4536_s6 + $0xf8] sm:$0xff] %vm1987_vm1, %v1505_v3  ;;  %v1984_v13 = vor.u32 1.1754944e-38, %v1983_v40  ;;  %vm1982_vm9 = vcmp.eq.f32.partialorder %v1981_v25, 8.507059e+37 }
 0x1b7   :  { %v2634_v21 = vpop.eup %2633 }
 0x1b8   :  { %v1973_v1 = vmul.f32 %v2634_v21, %v1026_v60  ;;  %vm1978_vm4 = vweird.f32 %v2634_v21 }
 0x1b9   :  { %vm1979_vm6 = vmor %vm1977_vm5, %vm1978_vm4 }
 0x1ba   :  { %v1974_v44 = vsub.f32 1.0, %v1973_v1 }
 0x1bc   :  { %v1975_v28 = vmul.f32 %v2634_v21, %v1974_v44 }
 0x1be   :  { %v1976_v19 = vadd.f32 %v2634_v21, %v1975_v28 }
 0x1c0   :  { %v1980_v34 = vsel %vm1979_vm6, %v2634_v21, %v1976_v19 }
 0x1c1   :  { %v1985_v11 = vsel %vm1982_vm9, %v1984_v13, %v1980_v34 }
 0x1c2   :  { %2051 = vst.msk [vmem:[%s4536_s6 + $0x1f8] sm:$0xff] %vm1987_vm1, %v1985_v11 }
 0x1c3   :  { %2664 = dma.done.wait [#allocation3], 8192  }
 0x1c4   :  { %2665 = vsyncadd [#allocation3], 4294959104 }
 0x1c5   :  { %2073 = vsyncpa [#allocation3], 1 }

</bundles_post_ra>
